<compile_context>
chip_gen: v7x
topology: tpu7x:2x2x1
jax: 0.10.0
libtpu: 0.0.40
codegen_flags: <defaults>
</compile_context>

<pallas_src>
import functools

import jax
import jax.numpy as jnp
from jax.experimental import pallas as pl
from jax.experimental.pallas import tpu as pltpu


# ----------------------------- Pallas kernel ------------------------------ #
def _lstm_kernel(num_layers, N, K, H,
                 feat_ref, g_ref, wx_ref, bx_ref, wh_ref, out_ref):
    f32 = jnp.float32

    x = feat_ref[...]            # (N, D)
    g = g_ref[...]               # (N*K, N)   one-hot neighbor gather
    wx = wx_ref[...]             # (D, 4H)    stacked x-weights [i | o | u | f]
    bx = bx_ref[...]             # (1, 4H)    stacked biases    [i | o | u | f]
    wh = wh_ref[...]             # (H, 4H)    stacked h-weights [i | o | u | f]

    # message mask over the packed (h | c) carry: zero out node 0
    row_idx = jax.lax.broadcasted_iota(jnp.int32, (N, 2 * H), 0)
    mask = (row_idx != 0).astype(f32)

    # Layer-invariant, lane-dense x pre-activations: one (N,D)@(D,4H) matmul.
    zx = jnp.dot(x, wx, preferred_element_type=f32) + bx        # (N, 4H)
    zx_iou = zx[:, :3 * H]                                      # (N, 3H)
    zf_x = zx[:, 3 * H:]                                        # (N, H)
    # row-repeat (N,H) -> (N,K,H) -> (N*K,H) without a one-hot repeat matmul
    fx_rep = jnp.broadcast_to(zf_x[:, None, :], (N, K, H)).reshape(N * K, H)

    def layer(_, hc):
        # h and c neighbor gather in a single lane-packed matmul.
        hc_nb = jnp.dot(g, hc, preferred_element_type=f32)      # (N*K, 2H)
        h_nb = hc_nb[:, :H]                                     # (N*K, H)
        c_nb = hc_nb[:, H:]                                     # (N*K, H)

        # All hidden-state gate projections in one lane-dense matmul.
        zh = jnp.dot(h_nb, wh, preferred_element_type=f32)      # (N*K, 4H)
        # i/o/u use the K-sum of neighbor hidden states; sum after the matmul.
        pre_iou = zx_iou + zh[:, :3 * H].reshape(N, K, 3 * H).sum(axis=1)
        pre_f = fx_rep + zh[:, 3 * H:]                          # (N*K, H)

        sig = jax.nn.sigmoid(pre_iou)                           # packed sigmoid
        i_g = sig[:, :H]
        o_g = sig[:, H:2 * H]
        u_g = jnp.tanh(pre_iou[:, 2 * H:])
        f_g = jax.nn.sigmoid(pre_f)

        fc_sum = (f_g * c_nb).reshape(N, K, H).sum(axis=1)      # (N, H)
        c_new = i_g * u_g + fc_sum
        h_new = o_g * jnp.tanh(c_new)
        return jnp.concatenate([h_new, c_new], axis=-1) * mask  # (N, 2H)

    hc0 = jnp.zeros((N, 2 * H), f32)
    hc = jax.lax.fori_loop(0, num_layers, layer, hc0, unroll=True)

    # single packed store (64 lanes instead of two 32-lane masked stores)
    out_ref[...] = hc


# ------------------------------ JAX wrapper -------------------------------- #
def custom_lstm_forward(features, adjacency, params, num_layers):
    """features: (N, D) f32, adjacency: (N, K) int32 neighbor indices."""
    N, D = features.shape
    K = adjacency.shape[1]
    H = params["Wi"].shape[0]

    # Only remaining dense helper: neighbor gather expressed as one-hot matmul.
    g = jax.nn.one_hot(adjacency.reshape(-1), N, dtype=jnp.float32)   # (N*K, N)

    def split(W):
        Wt = W.astype(jnp.float32).T            # (D+H, H)
        return Wt[:D], Wt[D:]

    wix, wih = split(params["Wi"])
    wox, woh = split(params["Wo"])
    wfx, wfh = split(params["Wf"])
    wux, wuh = split(params["Wu"])

    # Stacked, lane-dense gate weights / biases.
    wx = jnp.concatenate([wix, wox, wux, wfx], axis=1)                # (D, 4H)
    bx = jnp.concatenate([params["bi"], params["bo"],
                          params["bu"], params["bf"]]
                         ).astype(jnp.float32).reshape(1, 4 * H)      # (1, 4H)
    wh = jnp.concatenate([wih, woh, wuh, wfh], axis=1)                # (H, 4H)

    inputs = (features.astype(jnp.float32), g, wx, bx, wh)

    # Everything is resident: no grid, whole-array VMEM specs (no pipelining).
    vmem = pl.BlockSpec(memory_space=pltpu.MemorySpace.VMEM)
    out = pl.pallas_call(
        functools.partial(_lstm_kernel, num_layers, N, K, H),
        out_shape=jax.ShapeDtypeStruct((N, 2 * H), jnp.float32),
        in_specs=[vmem] * len(inputs),
        out_specs=vmem,
    )(*inputs)
    return out[:, :H], out[:, H:]


# --------------------------- Pure-JAX reference ---------------------------- #
def reference_forward(features, adjacency, params, num_layers):
    N, D = features.shape
    K = adjacency.shape[1]
    H = params["Wi"].shape[0]
    h = jnp.zeros((N, H), jnp.float32)
    c = jnp.zeros((N, H), jnp.float32)
    mask = jnp.ones((N, 1), jnp.float32).at[0, 0].set(0.0)
    for _ in range(num_layers):
        h_nb = h[adjacency]                  # (N, K, H)
        c_nb = c[adjacency]
        combined = h_nb.sum(axis=1)
        xi = jnp.concatenate([features, combined], axis=-1)
        i_g = jax.nn.sigmoid(xi @ params["Wi"].T + params["bi"])
        o_g = jax.nn.sigmoid(xi @ params["Wo"].T + params["bo"])
        u_g = jnp.tanh(xi @ params["Wu"].T + params["bu"])
        exp_x = jnp.broadcast_to(features[:, None, :], (N, K, D))
        xf = jnp.concatenate([exp_x, h_nb], axis=-1)
        f_g = jax.nn.sigmoid(xf @ params["Wf"].T + params["bf"])
        c_new = i_g * u_g + (f_g * c_nb).sum(axis=1)
        h_new = o_g * jnp.tanh(c_new)
        h = h_new * mask
        c = c_new * mask
    return h, c


# ---------------------------------- main ----------------------------------- #
if __name__ == "__main__":
    N, K, D, H, NUM_LAYERS = 16, 4, 8, 32, 3

    key = jax.random.PRNGKey(0)
    k_feat, k_adj, *k_w = jax.random.split(key, 2 + 8)

    features = jax.random.normal(k_feat, (N, D), dtype=jnp.float32)
    adjacency = jax.random.randint(k_adj, (N, K), 0, N, dtype=jnp.int32)

    # Deterministic nn.Linear-style init: U(-1/sqrt(fan_in), 1/sqrt(fan_in)).
    fan_in = D + H
    bound = 1.0 / (fan_in ** 0.5)

    def init_linear(kw, kb):
        W = jax.random.uniform(kw, (H, fan_in), jnp.float32, -bound, bound)
        b = jax.random.uniform(kb, (H,), jnp.float32, -bound, bound)
        return W, b

    Wi, bi = init_linear(k_w[0], k_w[1])
    Wo, bo = init_linear(k_w[2], k_w[3])
    Wf, bf = init_linear(k_w[4], k_w[5])
    Wu, bu = init_linear(k_w[6], k_w[7])
    params = dict(Wi=Wi, bi=bi, Wo=Wo, bo=bo, Wf=Wf, bf=bf, Wu=Wu, bu=bu)

    h_k, c_k = custom_lstm_forward(features, adjacency, params, NUM_LAYERS)
    jax.block_until_ready((h_k, c_k))

    h_r, c_r = reference_forward(features, adjacency, params, NUM_LAYERS)
    assert jnp.allclose(h_k, h_r, atol=1e-5, rtol=1e-5), "h mismatch"
    assert jnp.allclose(c_k, c_r, atol=1e-5, rtol=1e-5), "c mismatch"

    print("KERNEL_OK")
</pallas_src>

<mosaic_0001>
module attributes {stable_mosaic.version = 11 : i64} {
  func.func @_lstm_kernel(%arg0: memref<16x8xf32, #tpu.memory_space<vmem>>, %arg1: memref<64x16xf32, #tpu.memory_space<vmem>>, %arg2: memref<8x128xf32, #tpu.memory_space<vmem>>, %arg3: memref<1x128xf32, #tpu.memory_space<vmem>>, %arg4: memref<32x128xf32, #tpu.memory_space<vmem>>, %arg5: memref<16x64xf32, #tpu.memory_space<vmem>>) attributes {dimension_semantics = [], scalar_prefetch = 0 : i64, scratch_operands = 0 : i64, tpu.core_type = #tpu.core_type<tc>} {
    %c0 = arith.constant 0 : index
    %c0_0 = arith.constant 0 : index
    %0 = vector.load %arg0[%c0, %c0_0] : memref<16x8xf32, #tpu.memory_space<vmem>>, vector<16x8xf32>
    %c0_1 = arith.constant 0 : index
    %c0_2 = arith.constant 0 : index
    %1 = vector.load %arg1[%c0_1, %c0_2] : memref<64x16xf32, #tpu.memory_space<vmem>>, vector<64x16xf32>
    %c0_3 = arith.constant 0 : index
    %c0_4 = arith.constant 0 : index
    %2 = vector.load %arg2[%c0_3, %c0_4] : memref<8x128xf32, #tpu.memory_space<vmem>>, vector<8x128xf32>
    %c0_5 = arith.constant 0 : index
    %c0_6 = arith.constant 0 : index
    %3 = vector.load %arg3[%c0_5, %c0_6] : memref<1x128xf32, #tpu.memory_space<vmem>>, vector<1x128xf32>
    %c0_7 = arith.constant 0 : index
    %c0_8 = arith.constant 0 : index
    %4 = vector.load %arg4[%c0_7, %c0_8] : memref<32x128xf32, #tpu.memory_space<vmem>>, vector<32x128xf32>
    %5 = tpu.iota {dimensions = array<i32: 0>} : vector<16x64xi32>
    %c0_i32 = arith.constant 0 : i32
    %6 = vector.broadcast %c0_i32 : i32 to vector<16x64xi32>
    %7 = arith.cmpi ne, %5, %6 : vector<16x64xi32>
    %8 = arith.extui %7 : vector<16x64xi1> to vector<16x64xi32>
    %9 = arith.sitofp %8 : vector<16x64xi32> to vector<16x64xf32>
    %cst = arith.constant dense<0.000000e+00> : vector<16x128xf32>
    %10 = tpu.matmul %0, %2, %cst {dimension_numbers = #tpu.dot_dimension_numbers<[1], [0], [0], [1], [0, 0, 1, 1], [], []>} : vector<16x8xf32>, vector<8x128xf32>, vector<16x128xf32> -> vector<16x128xf32>
    %11 = vector.broadcast %3 : vector<1x128xf32> to vector<16x128xf32>
    %12 = arith.addf %10, %11 : vector<16x128xf32>
    %13 = vector.extract_strided_slice %12 {offsets = [0, 0], sizes = [16, 96], strides = [1, 1]} : vector<16x128xf32> to vector<16x96xf32>
    %14 = vector.extract_strided_slice %12 {offsets = [0, 96], sizes = [16, 32], strides = [1, 1]} : vector<16x128xf32> to vector<16x32xf32>
    %15 = vector.shape_cast %14 : vector<16x32xf32> to vector<16x1x32xf32>
    %16 = vector.shape_cast %15 : vector<16x1x32xf32> to vector<16x1x32xf32>
    %17 = vector.broadcast %16 : vector<16x1x32xf32> to vector<16x4x32xf32>
    %18 = vector.shape_cast %17 : vector<16x4x32xf32> to vector<64x32xf32>
    %cst_9 = arith.constant 0.000000e+00 : f32
    %19 = vector.broadcast %cst_9 : f32 to vector<16x64xf32>
    %c0_i32_10 = arith.constant 0 : i32
    %cst_11 = arith.constant dense<0.000000e+00> : vector<64x64xf32>
    %20 = tpu.matmul %1, %19, %cst_11 {dimension_numbers = #tpu.dot_dimension_numbers<[1], [0], [0], [1], [0, 0, 1, 1], [], []>} : vector<64x16xf32>, vector<16x64xf32>, vector<64x64xf32> -> vector<64x64xf32>
    %21 = vector.extract_strided_slice %20 {offsets = [0, 0], sizes = [64, 32], strides = [1, 1]} : vector<64x64xf32> to vector<64x32xf32>
    %22 = vector.extract_strided_slice %20 {offsets = [0, 32], sizes = [64, 32], strides = [1, 1]} : vector<64x64xf32> to vector<64x32xf32>
    %cst_12 = arith.constant dense<0.000000e+00> : vector<64x128xf32>
    %23 = tpu.matmul %21, %4, %cst_12 {dimension_numbers = #tpu.dot_dimension_numbers<[1], [0], [0], [1], [0, 0, 1, 1], [], []>} : vector<64x32xf32>, vector<32x128xf32>, vector<64x128xf32> -> vector<64x128xf32>
    %24 = vector.extract_strided_slice %23 {offsets = [0, 0], sizes = [64, 96], strides = [1, 1]} : vector<64x128xf32> to vector<64x96xf32>
    %25 = vector.shape_cast %24 : vector<64x96xf32> to vector<16x4x96xf32>
    %cst_13 = arith.constant dense<0.000000e+00> : vector<16x96xf32>
    %26 = vector.multi_reduction <add>, %25, %cst_13 [1] : vector<16x4x96xf32> to vector<16x96xf32>
    %27 = arith.addf %13, %26 : vector<16x96xf32>
    %28 = vector.extract_strided_slice %23 {offsets = [0, 96], sizes = [64, 32], strides = [1, 1]} : vector<64x128xf32> to vector<64x32xf32>
    %29 = arith.addf %18, %28 : vector<64x32xf32>
    %30 = arith.negf %27 : vector<16x96xf32>
    %31 = math.exp %30 : vector<16x96xf32>
    %cst_14 = arith.constant 1.000000e+00 : f32
    %32 = vector.broadcast %cst_14 : f32 to vector<16x96xf32>
    %33 = arith.addf %32, %31 : vector<16x96xf32>
    %34 = arith.divf %32, %33 : vector<16x96xf32>
    %35 = vector.extract_strided_slice %34 {offsets = [0, 0], sizes = [16, 32], strides = [1, 1]} : vector<16x96xf32> to vector<16x32xf32>
    %36 = vector.extract_strided_slice %34 {offsets = [0, 32], sizes = [16, 32], strides = [1, 1]} : vector<16x96xf32> to vector<16x32xf32>
    %37 = vector.extract_strided_slice %27 {offsets = [0, 64], sizes = [16, 32], strides = [1, 1]} : vector<16x96xf32> to vector<16x32xf32>
    %38 = math.tanh %37 : vector<16x32xf32>
    %39 = arith.negf %29 : vector<64x32xf32>
    %40 = math.exp %39 : vector<64x32xf32>
    %cst_15 = arith.constant 1.000000e+00 : f32
    %41 = vector.broadcast %cst_15 : f32 to vector<64x32xf32>
    %42 = arith.addf %41, %40 : vector<64x32xf32>
    %43 = arith.divf %41, %42 : vector<64x32xf32>
    %44 = arith.mulf %43, %22 : vector<64x32xf32>
    %45 = vector.shape_cast %44 : vector<64x32xf32> to vector<16x4x32xf32>
    %cst_16 = arith.constant dense<0.000000e+00> : vector<16x32xf32>
    %46 = vector.multi_reduction <add>, %45, %cst_16 [1] : vector<16x4x32xf32> to vector<16x32xf32>
    %47 = arith.mulf %35, %38 : vector<16x32xf32>
    %48 = arith.addf %47, %46 : vector<16x32xf32>
    %49 = math.tanh %48 : vector<16x32xf32>
    %50 = arith.mulf %36, %49 : vector<16x32xf32>
    %51 = tpu.concatenate %50, %48 in 1 : vector<16x32xf32>, vector<16x32xf32> -> vector<16x64xf32>
    %52 = arith.mulf %51, %9 : vector<16x64xf32>
    %c1_i32 = arith.constant 1 : i32
    %cst_17 = arith.constant dense<0.000000e+00> : vector<64x64xf32>
    %53 = tpu.matmul %1, %52, %cst_17 {dimension_numbers = #tpu.dot_dimension_numbers<[1], [0], [0], [1], [0, 0, 1, 1], [], []>} : vector<64x16xf32>, vector<16x64xf32>, vector<64x64xf32> -> vector<64x64xf32>
    %54 = vector.extract_strided_slice %53 {offsets = [0, 0], sizes = [64, 32], strides = [1, 1]} : vector<64x64xf32> to vector<64x32xf32>
    %55 = vector.extract_strided_slice %53 {offsets = [0, 32], sizes = [64, 32], strides = [1, 1]} : vector<64x64xf32> to vector<64x32xf32>
    %cst_18 = arith.constant dense<0.000000e+00> : vector<64x128xf32>
    %56 = tpu.matmul %54, %4, %cst_18 {dimension_numbers = #tpu.dot_dimension_numbers<[1], [0], [0], [1], [0, 0, 1, 1], [], []>} : vector<64x32xf32>, vector<32x128xf32>, vector<64x128xf32> -> vector<64x128xf32>
    %57 = vector.extract_strided_slice %56 {offsets = [0, 0], sizes = [64, 96], strides = [1, 1]} : vector<64x128xf32> to vector<64x96xf32>
    %58 = vector.shape_cast %57 : vector<64x96xf32> to vector<16x4x96xf32>
    %cst_19 = arith.constant dense<0.000000e+00> : vector<16x96xf32>
    %59 = vector.multi_reduction <add>, %58, %cst_19 [1] : vector<16x4x96xf32> to vector<16x96xf32>
    %60 = arith.addf %13, %59 : vector<16x96xf32>
    %61 = vector.extract_strided_slice %56 {offsets = [0, 96], sizes = [64, 32], strides = [1, 1]} : vector<64x128xf32> to vector<64x32xf32>
    %62 = arith.addf %18, %61 : vector<64x32xf32>
    %63 = arith.negf %60 : vector<16x96xf32>
    %64 = math.exp %63 : vector<16x96xf32>
    %cst_20 = arith.constant 1.000000e+00 : f32
    %65 = vector.broadcast %cst_20 : f32 to vector<16x96xf32>
    %66 = arith.addf %65, %64 : vector<16x96xf32>
    %67 = arith.divf %65, %66 : vector<16x96xf32>
    %68 = vector.extract_strided_slice %67 {offsets = [0, 0], sizes = [16, 32], strides = [1, 1]} : vector<16x96xf32> to vector<16x32xf32>
    %69 = vector.extract_strided_slice %67 {offsets = [0, 32], sizes = [16, 32], strides = [1, 1]} : vector<16x96xf32> to vector<16x32xf32>
    %70 = vector.extract_strided_slice %60 {offsets = [0, 64], sizes = [16, 32], strides = [1, 1]} : vector<16x96xf32> to vector<16x32xf32>
    %71 = math.tanh %70 : vector<16x32xf32>
    %72 = arith.negf %62 : vector<64x32xf32>
    %73 = math.exp %72 : vector<64x32xf32>
    %cst_21 = arith.constant 1.000000e+00 : f32
    %74 = vector.broadcast %cst_21 : f32 to vector<64x32xf32>
    %75 = arith.addf %74, %73 : vector<64x32xf32>
    %76 = arith.divf %74, %75 : vector<64x32xf32>
    %77 = arith.mulf %76, %55 : vector<64x32xf32>
    %78 = vector.shape_cast %77 : vector<64x32xf32> to vector<16x4x32xf32>
    %cst_22 = arith.constant dense<0.000000e+00> : vector<16x32xf32>
    %79 = vector.multi_reduction <add>, %78, %cst_22 [1] : vector<16x4x32xf32> to vector<16x32xf32>
    %80 = arith.mulf %68, %71 : vector<16x32xf32>
    %81 = arith.addf %80, %79 : vector<16x32xf32>
    %82 = math.tanh %81 : vector<16x32xf32>
    %83 = arith.mulf %69, %82 : vector<16x32xf32>
    %84 = tpu.concatenate %83, %81 in 1 : vector<16x32xf32>, vector<16x32xf32> -> vector<16x64xf32>
    %85 = arith.mulf %84, %9 : vector<16x64xf32>
    %c2_i32 = arith.constant 2 : i32
    %cst_23 = arith.constant dense<0.000000e+00> : vector<64x64xf32>
    %86 = tpu.matmul %1, %85, %cst_23 {dimension_numbers = #tpu.dot_dimension_numbers<[1], [0], [0], [1], [0, 0, 1, 1], [], []>} : vector<64x16xf32>, vector<16x64xf32>, vector<64x64xf32> -> vector<64x64xf32>
    %87 = vector.extract_strided_slice %86 {offsets = [0, 0], sizes = [64, 32], strides = [1, 1]} : vector<64x64xf32> to vector<64x32xf32>
    %88 = vector.extract_strided_slice %86 {offsets = [0, 32], sizes = [64, 32], strides = [1, 1]} : vector<64x64xf32> to vector<64x32xf32>
    %cst_24 = arith.constant dense<0.000000e+00> : vector<64x128xf32>
    %89 = tpu.matmul %87, %4, %cst_24 {dimension_numbers = #tpu.dot_dimension_numbers<[1], [0], [0], [1], [0, 0, 1, 1], [], []>} : vector<64x32xf32>, vector<32x128xf32>, vector<64x128xf32> -> vector<64x128xf32>
    %90 = vector.extract_strided_slice %89 {offsets = [0, 0], sizes = [64, 96], strides = [1, 1]} : vector<64x128xf32> to vector<64x96xf32>
    %91 = vector.shape_cast %90 : vector<64x96xf32> to vector<16x4x96xf32>
    %cst_25 = arith.constant dense<0.000000e+00> : vector<16x96xf32>
    %92 = vector.multi_reduction <add>, %91, %cst_25 [1] : vector<16x4x96xf32> to vector<16x96xf32>
    %93 = arith.addf %13, %92 : vector<16x96xf32>
    %94 = vector.extract_strided_slice %89 {offsets = [0, 96], sizes = [64, 32], strides = [1, 1]} : vector<64x128xf32> to vector<64x32xf32>
    %95 = arith.addf %18, %94 : vector<64x32xf32>
    %96 = arith.negf %93 : vector<16x96xf32>
    %97 = math.exp %96 : vector<16x96xf32>
    %cst_26 = arith.constant 1.000000e+00 : f32
    %98 = vector.broadcast %cst_26 : f32 to vector<16x96xf32>
    %99 = arith.addf %98, %97 : vector<16x96xf32>
    %100 = arith.divf %98, %99 : vector<16x96xf32>
    %101 = vector.extract_strided_slice %100 {offsets = [0, 0], sizes = [16, 32], strides = [1, 1]} : vector<16x96xf32> to vector<16x32xf32>
    %102 = vector.extract_strided_slice %100 {offsets = [0, 32], sizes = [16, 32], strides = [1, 1]} : vector<16x96xf32> to vector<16x32xf32>
    %103 = vector.extract_strided_slice %93 {offsets = [0, 64], sizes = [16, 32], strides = [1, 1]} : vector<16x96xf32> to vector<16x32xf32>
    %104 = math.tanh %103 : vector<16x32xf32>
    %105 = arith.negf %95 : vector<64x32xf32>
    %106 = math.exp %105 : vector<64x32xf32>
    %cst_27 = arith.constant 1.000000e+00 : f32
    %107 = vector.broadcast %cst_27 : f32 to vector<64x32xf32>
    %108 = arith.addf %107, %106 : vector<64x32xf32>
    %109 = arith.divf %107, %108 : vector<64x32xf32>
    %110 = arith.mulf %109, %88 : vector<64x32xf32>
    %111 = vector.shape_cast %110 : vector<64x32xf32> to vector<16x4x32xf32>
    %cst_28 = arith.constant dense<0.000000e+00> : vector<16x32xf32>
    %112 = vector.multi_reduction <add>, %111, %cst_28 [1] : vector<16x4x32xf32> to vector<16x32xf32>
    %113 = arith.mulf %101, %104 : vector<16x32xf32>
    %114 = arith.addf %113, %112 : vector<16x32xf32>
    %115 = math.tanh %114 : vector<16x32xf32>
    %116 = arith.mulf %102, %115 : vector<16x32xf32>
    %117 = tpu.concatenate %116, %114 in 1 : vector<16x32xf32>, vector<16x32xf32> -> vector<16x64xf32>
    %118 = arith.mulf %117, %9 : vector<16x64xf32>
    %c0_29 = arith.constant 0 : index
    %c0_30 = arith.constant 0 : index
    %119 = vector.load %arg5[%c0_29, %c0_30] : memref<16x64xf32, #tpu.memory_space<vmem>>, vector<16x64xf32>
    tpu.vector_store %arg5[%c0_29, %c0_30], %118 {strides = array<i32>} : memref<16x64xf32, #tpu.memory_space<vmem>>, vector<16x64xf32>,
    return
  }
}

</mosaic_0001>

<bundles_post_ra>
// kernel: tpu_custom_call.1
= control target key start
LH: loop header
LB: loop body
LE: loop exit
PB: predicated region body
PF: predicated region fallthrough
CT: control target
= control target key end

     0   :  { %v37_v0 = vlaneseq  ;;  %vm314_vm0 = vcmask 130048   ;;  %v3358_v3 = vmov 0.0   ;;  %vm52_vm1 = vcmask 64512   ;;  %s4245_s0 = inlined_call_operand.vmem [shape: f32[16,8], index: 0, kind: input, shape index: {}]   ;;  %s4246_s1 = inlined_call_operand.vmem [shape: f32[64,16], index: 1, kind: input, shape index: {}]   ;;  %s4247_s2 = inlined_call_operand.vmem [shape: f32[8,128], index: 2, kind: input, shape index: {}]   ;;  %s4248_s3 = inlined_call_operand.vmem [shape: f32[1,128], index: 3, kind: input, shape index: {}]   ;;  %s4249_s4 = inlined_call_operand.vmem [shape: f32[32,128], index: 4, kind: input, shape index: {}]   ;;  %s4250_s5 = inlined_call_operand.hbm [shape: f32[16,64], index: 5, kind: output, shape index: {}]  }
   0x1   :  { %v3399_v1 = vld [vmem:[%s4246_s1] sm:$0xff]  ;;  %v24_v2 = vld [vmem:[%s4246_s1 + $0x8] sm:$0xff]  ;;  %2929 = vmatprep.subr.mxu1 %v3358_v3  ;;  %v25_v4 = vld [vmem:[%s4246_s1 + $0x10] sm:$0xff] }
   0x2   :  { %2931 = vmatprep.mubr.msk.f32.mxu1 %vm314_vm0, %v3399_v1  ;;  %v3409_v5 = vshrl.u32 %v37_v0, 7  ;;  %2930 = vmatpush3.msra.mxu1 %v3358_v3  ;;  %v26_v6 = vld [vmem:[%s4246_s1 + $0x18] sm:$0xff]  ;;  %v31_v7 = vld [vmem:[%s4247_s2] sm:$0xff]  ;;  %v22_v9 = vld [vmem:[%s4245_s0 + $0x8] sm:$0xff] }
   0x3   :  { %2932 = vmatmul.mubr.msk.f32.vlgmr.msra.gmra.mrb[0].mxu1 %vm314_vm0, %v24_v2  ;;  %v21_v8 = vld [vmem:[%s4245_s0] sm:$0xff]  ;;  %2924 = vmatprep.subr.mxu0 %v31_v7  ;;  %v34_v11 = vld [vmem:[%s4249_s4 + $0x8] sm:$0xff]  ;;  %v35_v12 = vld [vmem:[%s4249_s4 + $0x10] sm:$0xff] }
   0x4   :  { %vm40_vm2 = vcmp.ne.s32.totalorder %v3409_v5, 0  ;;  %2934 = vmatprep.mubr.msk.f32.mxu1 %vm314_vm0, %v25_v4  ;;  %v33_v10 = vld [vmem:[%s4249_s4] sm:$0xff]  ;;  %2925 = vmatpush3.msra.mxu0 %v31_v7  ;;  %v36_v16 = vld [vmem:[%s4249_s4 + $0x18] sm:$0xff] }
   0x5   :  { %v3435_v13 = vsel %vm40_vm2, 1.0, %v3358_v3  ;;  %v27_v14 = vld [vmem:[%s4246_s1 + $0x20] sm:$0xff]  ;;  %2926 = vmatprep.mubr.msk.f32.mxu0 %vm52_vm1, %v21_v8  ;;  %v3441_v15 = vpack.c.bf16 %v34_v11, %v33_v10 }
   0x6   :  { %10 = vsyncpa [#allocation3], 0  ;;  %2927 = vmatmul.mubr.msk.f32.vlgmr.msra.gmra.mrb[0].mxu0 %vm52_vm1, %v22_v9  ;;  %v3447_v17 = vpack.c.bf16 %v36_v16, %v35_v12  ;;  %v28_v18 = vld [vmem:[%s4246_s1 + $0x28] sm:$0xff]  ;;  %v29_v19 = vld [vmem:[%s4246_s1 + $0x30] sm:$0xff]  ;;  %vm444_vm3 = vcmask 261120   ;;  %s3359_s20 = smov 64  }
   0x7   :  { %2935 = vmatmul.mubr.msk.f32.gmra.mrb[2].mxu1 %vm314_vm0, %v26_v6  ;;  %3036 = vmatprep.subr.bf16.mxu0 %v3441_v15  ;;  %v30_v20 = vld [vmem:[%s4246_s1 + $0x38] sm:$0xff]  ;;  %v3360_v39 = vmov 1966171168   ;;  %v2751_v42 = vld [vmem:[%s4248_s3] ss:$0 sm:$0xff]  ;;  %v236_v62 = vsub.s32 0, %v3409_v5 }
   0x8   :  { %2937 = vmatprep.mubr.msk.f32.mxu1 %vm314_vm0, %v27_v14  ;;  %3038 = vmatpush3.bf16.msra.mxu0 %v3441_v15  ;;  %v138_v40 = vunpack.c.l.s4 %v3360_v39  ;;  %vm598_vm4 = vcmask 781312   ;;  %vm727_vm5 = vcmask 1041409   ;;  %vm729_vm6 = vcmask 1042434   ;;  %s3361_s3 = smov 32   ;;  %s3362_s23 = smov 96  }
   0x9   :  { %3040 = vmatprep.subr.bf16.mxu0 %v3447_v17  ;;  %3067 = vmatprep.subr.bf16.mxu1 %v3441_v15  ;;  %vm731_vm7 = vcmask 1043459   ;;  %vm733_vm8 = vcmask 1044484   ;;  %vm735_vm9 = vcmask 1045509   ;;  %vm737_vm10 = vcmask 1046534  }
   0xa   :  { %3069 = vmatpush3.bf16.msra.mxu1 %v3441_v15  ;;  %v139_v41 = vunpack.c.0.s8 %v138_v40  ;;  %vm950_vm11 = vcmask 1044224   ;;  %vm739_vm12 = vcmask 1047559   ;;  %vm2731_vm13 = vcmask 523264  }
   0xb   :  { %2938 = vmatmul.mubr.msk.f32.gmra.mrb[4].mxu1 %vm314_vm0, %v28_v18  ;;  %3068 = vmatprep.subr.bf16.mxu1 %v3447_v17 }
   0xc   :  { %2940 = vmatprep.mubr.msk.f32.mxu1 %vm314_vm0, %v29_v19  ;;  %3042 = vmatpush3.bf16.msra.mxu0 %v3447_v17  ;;  %v142_v44 = vsub.s32 %v139_v41, %v3409_v5 }
   0xd   :  { %3048 = vmatprep.subr.bf16.mxu0 %v3441_v15 }
   0xe   :  { %3070 = vmatpush3.bf16.msra.mxu1 %v3447_v17 }
   0xf   :  { %2941 = vmatmul.mubr.msk.f32.gmra.mrb[6].mxu1 %vm314_vm0, %v30_v20 }
  0xd6   :  { %v2933_v21 = vpop.f32.mrb[0].mxu1 }
  0xd7   :  { %890 = vrot.lane.b32.xlu1 %v2933_v21, %s3359_s20  ;;  %v405_v22 = vpop.f32.mrb[1].mxu1  ;;  %v879_v23 = vcombine.high %v2933_v21, %v2933_v21 }
  0xd8   :  { %886 = vrot.lane.b32.xlu0 %v405_v22, %s3359_s20  ;;  %2951 = vmatprep.mubr.msk.f32.mxu0 %vm444_vm3, %v405_v22  ;;  %v878_v24 = vcombine.high %v405_v22, %v405_v22 }
  0xd9   :  { %2952 = vmatmul.mubr.msk.f32.vlgmr.msra.gmra.mrb[2].mxu0 %vm444_vm3, %v2933_v21  ;;  %v2928_v34 = vpop.f32.mrb[0].mxu0 }
  0xda   :  { %v2936_v25 = vpop.f32.mrb[2].mxu1  ;;  %3050 = vmatpush3.bf16.msra.mxu0 %v3441_v15  ;;  %v125_v35 = vpop.f32.mrb[1].mxu0  ;;  %v3508_v45 = vadd.f32 %v2928_v34, %v2751_v42 }
  0xdb   :  { %892 = vrot.lane.b32.xlu1 %v879_v23, %s3359_s20  ;;  %v415_v26 = vpop.f32.mrb[3].mxu1  ;;  %3052 = vmatprep.subr.bf16.mxu0 %v3447_v17  ;;  %v881_v37 = vcombine.high %v2936_v25, %v2936_v25  ;;  %v3505_v43 = vadd.f32 %v2751_v42, %v125_v35 }
  0xdc   :  { %888 = vrot.lane.b32.xlu0 %v878_v24, %s3359_s20  ;;  %2954 = vmatprep.mubr.msk.f32.mxu0 %vm444_vm3, %v415_v26  ;;  %v880_v33 = vcombine.high %v415_v26, %v415_v26  ;;  %v185_v47 = vcombine.high %v3508_v45, %v3508_v45  ;;  %v192_v50 = vrot.slane %v3508_v45, %v142_v44 }
  0xdd   :  { %2955 = vmatmul.mubr.msk.f32.gmra.mrb[4].mxu0 %vm444_vm3, %v2936_v25  ;;  %v136_v46 = vcombine.high %v3505_v43, %v3505_v43  ;;  %v143_v48 = vrot.slane %v3505_v43, %v142_v44 }
  0xde   :  { %v2939_v27 = vpop.f32.mrb[4].mxu1  ;;  %3054 = vmatpush3.bf16.msra.mxu0 %v3447_v17  ;;  %v199_v52 = vrot.slane %v185_v47, %v142_v44  ;;  %v200_v54 = vcombine.high %v192_v50, %v192_v50  ;;  %v208_v60 = vrot.slane %v192_v50, %v142_v44 }
  0xdf   :  { %906 = vrot.lane.b32.xlu1 %v2939_v27, %s3359_s20  ;;  %v425_v28 = vpop.f32.mrb[5].mxu1  ;;  %3060 = vmatprep.subr.bf16.mxu0 %v3441_v15  ;;  %v883_v29 = vcombine.high %v2939_v27, %v2939_v27  ;;  %v150_v49 = vrot.slane %v136_v46, %v142_v44  ;;  %v151_v51 = vcombine.high %v143_v48, %v143_v48 }
  0xe0   :  { %898 = vrot.lane.b32.xlu0 %v2936_v25, %s3359_s20  ;;  %2957 = vmatprep.mubr.msk.f32.mxu0 %vm444_vm3, %v425_v28  ;;  %v882_v32 = vcombine.high %v425_v28, %v425_v28  ;;  %v159_v55 = vrot.slane %v143_v48, %v142_v44  ;;  %v201_v57 = vcombine.high %v199_v52, %v199_v52 }
  0xe1   :  { %2958 = vmatmul.mubr.msk.f32.gmra.mrb[6].mxu0 %vm444_vm3, %v2939_v27  ;;  %v152_v53 = vcombine.high %v150_v49, %v150_v49  ;;  %v173_v56 = vrot.slane %v151_v51, %v142_v44  ;;  %v166_v58 = vrot.slane %v150_v49, %v142_v44  ;;  %v222_v61 = vrot.slane %v200_v54, %v142_v44 }
  0xe2   :  { %v2942_v30 = vpop.f32.mrb[6].mxu1  ;;  %v181_v63 = vcombine.high %v159_v55, %v159_v55  ;;  %v215_v0 = vrot.slane %v199_v52, %v142_v44  ;;  %v229_v2 = vrot.slane %v201_v57, %v142_v44  ;;  %v230_v6 = vcombine.high %v208_v60, %v208_v60 }
  0xe3   :  { %908 = vrot.lane.b32.xlu1 %v883_v29, %s3359_s20  ;;  %v435_v31 = vpop.f32.mrb[7].mxu1  ;;  %v885_v38 = vcombine.high %v2942_v30, %v2942_v30  ;;  %v180_v59 = vrot.slane %v152_v53, %v142_v44  ;;  %v182_v3 = vcombine.high %v166_v58, %v166_v58  ;;  %v232_v7 = vcombine.high %v222_v61, %v222_v61 }
  0xe4   :  { %894 = vrot.lane.b32.xlu0 %v415_v26, %s3359_s20  ;;  %2960 = vmatprep.mubr.msk.f32.mxu1 %vm444_vm3, %v435_v31  ;;  %v884_v36 = vcombine.high %v435_v31, %v435_v31  ;;  %v3517_v8 = vrot.slane %v181_v63, %v236_v62  ;;  %v231_v9 = vcombine.high %v215_v0, %v215_v0 }
  0xe5   :  { %2961 = vmatmul.mubr.msk.f32.vlgmr.msra.gmra.mrb[8].mxu1 %vm444_vm3, %v2942_v30  ;;  %v184_v4 = vcombine.high %v180_v59, %v180_v59  ;;  %v3521_v11 = vrot.slane %v159_v55, %v236_v62  ;;  %v233_v12 = vcombine.high %v229_v2, %v229_v2  ;;  %v3523_v14 = vrot.slane %v173_v56, %v236_v62 }
  0xe6   :  { %2967 = vmatprep.mubr.msk.f32.mxu1 %vm314_vm0, %v3399_v1  ;;  %v183_v1 = vcombine.high %v173_v56, %v173_v56  ;;  %v3525_v5 = vrot.slane %v182_v3, %v236_v62  ;;  %v3529_v18 = vrot.slane %v166_v58, %v236_v62  ;;  %v3531_v19 = vrot.slane %v180_v59, %v236_v62 }
  0xe7   :  { %904 = vrot.lane.b32.xlu1 %v882_v32, %s3359_s20  ;;  %v3527_v16 = vrot.slane %v184_v4, %v236_v62  ;;  %v3533_v20 = vrot.slane %v230_v6, %v236_v62  ;;  %v3535_v21 = vrot.slane %v232_v7, %v236_v62  ;;  %v3537_v22 = vrot.slane %v208_v60, %v236_v62 }
  0xe8   :  { %896 = vrot.lane.b32.xlu0 %v880_v33, %s3359_s20  ;;  %v3519_v10 = vrot.slane %v183_v1, %v236_v62  ;;  %v3539_v24 = vrot.slane %v222_v61, %v236_v62  ;;  %v3541_v25 = vrot.slane %v231_v9, %v236_v62  ;;  %v3543_v26 = vrot.slane %v215_v0, %v236_v62 }
  0xe9   :  { %v3545_v27 = vrot.slane %v229_v2, %v236_v62  ;;  %v3549_v32 = vrot.slane %v233_v12, %v236_v62 }
  0xeb   :  { %910 = vrot.lane.b32.xlu1 %v435_v31, %s3359_s20 }
  0xec   :  { %902 = vrot.lane.b32.xlu0 %v425_v28, %s3359_s20 }
  0xef   :  { %912 = vrot.lane.b32.xlu1 %v884_v36, %s3359_s20 }
  0xf0   :  { %900 = vrot.lane.b32.xlu0 %v881_v37, %s3359_s20 }
  0xf3   :  { %916 = vrot.lane.b32.xlu1 %v885_v38, %s3359_s20 }
  0xf4   :  { %914 = vrot.lane.b32.xlu0 %v2942_v30, %s3359_s20 }
 0x1ac   :  { %v2953_v23 = vpop.f32.mrb[2].mxu0 }
 0x1ad   :  { %v583_v28 = vcombine.high %v2953_v23, %v2953_v23  ;;  %v613_v29 = vsel %vm598_vm4, %v2953_v23, 0.0  ;;  %v754_v30 = vadd.f32 %v2953_v23, %v3517_v8  ;;  %v535_v31 = vpop.f32.mrb[3].mxu0 }
 0x1ae   :  { %v614_v33 = vrot.slane %v613_v29, 4  ;;  %v582_v34 = vcombine.high %v535_v31, %v535_v31  ;;  %v599_v35 = vsel %vm598_vm4, %v535_v31, 0.0  ;;  %v752_v36 = vadd.f32 %v535_v31, %v3521_v11 }
 0x1af   :  { %v620_v37 = vsel %vm598_vm4, %v583_v28, 0.0  ;;  %v755_v38 = vadd.f32 %v583_v28, %v3519_v10  ;;  %v2774_v39 = vmul.f32 -1.442695, %v754_v30  ;;  %v600_v40 = vrot.slane %v599_v35, 4 }
 0x1b0   :  { %v615_v41 = vadd.f32 %v614_v33, %v613_v29  ;;  %v621_v42 = vrot.slane %v620_v37, 4  ;;  %v606_v44 = vsel %vm598_vm4, %v582_v34, 0.0  ;;  %v753_v46 = vadd.f32 %v582_v34, %v3523_v14  ;;  %v2956_v47 = vpop.f32.mrb[4].mxu0 }
 0x1b1   :  { %3079 = vpow2.f32 %v2774_v39  ;;  %v2775_v48 = vmul.f32 -1.442695, %v755_v38  ;;  %v601_v49 = vadd.f32 %v600_v40, %v599_v35  ;;  %v607_v50 = vrot.slane %v606_v44, 4  ;;  %v3557_v51 = vpop.f32.mrb[5].mxu0 }
 0x1b2   :  { %v616_v52 = vrot.slane %v615_v41, 2  ;;  %v622_v53 = vadd.f32 %v621_v42, %v620_v37  ;;  %v2772_v54 = vmul.f32 -1.442695, %v752_v36  ;;  %v2773_v55 = vmul.f32 -1.442695, %v753_v46 }
 0x1b3   :  { %3081 = vpow2.f32 %v2775_v48  ;;  %v602_v56 = vrot.slane %v601_v49, 2  ;;  %v608_v57 = vadd.f32 %v607_v50, %v606_v44  ;;  %v585_v58 = vcombine.high %v2956_v47, %v2956_v47  ;;  %v3575_v50 = vpop.permute.xlu0 %886 }
 0x1b4   :  { %v617_v59 = vadd.f32 %v616_v52, %v615_v41  ;;  %v623_v60 = vrot.slane %v622_v53, 2  ;;  %3083 = vpow2.f32 %v2772_v54  ;;  %v641_v61 = vsel %vm598_vm4, %v2956_v47, 0.0  ;;  %v3560_v62 = vpop.f32.mrb[6].mxu0 }
 0x1b5   :  { %v603_v63 = vadd.f32 %v602_v56, %v601_v49  ;;  %v609_v0 = vrot.slane %v608_v57, 2  ;;  %3085 = vpow2.f32 %v2773_v55  ;;  %v642_v1 = vrot.slane %v641_v61, 4  ;;  %v3562_v2 = vpop.f32.mrb[7].mxu0 }
 0x1b6   :  { %v618_v3 = vrot.slane %v617_v59, 1  ;;  %v624_v4 = vadd.f32 %v623_v60, %v622_v53  ;;  %v648_v6 = vsel %vm598_vm4, %v585_v58, 0.0  ;;  %v758_v7 = vadd.f32 %v2956_v47, %v3525_v5 }
 0x1b7   :  { %v604_v9 = vrot.slane %v603_v63, 1  ;;  %v610_v12 = vadd.f32 %v609_v0, %v608_v57  ;;  %v643_v23 = vadd.f32 %v642_v1, %v641_v61  ;;  %v649_v28 = vrot.slane %v648_v6, 4 }
 0x1b8   :  { %v619_v29 = vadd.f32 %v618_v3, %v617_v59  ;;  %v625_v30 = vrot.slane %v624_v4, 1  ;;  %v759_v31 = vadd.f32 %v585_v58, %v3527_v16  ;;  %v2778_v33 = vmul.f32 -1.442695, %v758_v7  ;;  %v3567_v34 = vpop.f32.mrb[8].mxu1 }
 0x1b9   :  { %v605_v35 = vadd.f32 %v604_v9, %v603_v63  ;;  %v611_v36 = vrot.slane %v610_v12, 1  ;;  %v644_v37 = vrot.slane %v643_v23, 2  ;;  %v650_v38 = vadd.f32 %v649_v28, %v648_v6  ;;  %v3569_v39 = vpop.f32.mrb[9].mxu1 }
 0x1ba   :  { %v626_v40 = vadd.f32 %v625_v30, %v624_v4  ;;  %3087 = vpow2.f32 %v2778_v33  ;;  %v2779_v41 = vmul.f32 -1.442695, %v759_v31  ;;  %v584_v42 = vcombine.high %v3557_v51, %v3557_v51  ;;  %v889_v31 = vpop.permute.xlu0 %888 }
 0x1bb   :  { %v3080_v44 = vpop.eup %3079  ;;  %v612_v46 = vadd.f32 %v611_v36, %v610_v12  ;;  %v645_v47 = vadd.f32 %v644_v37, %v643_v23  ;;  %v651_v48 = vrot.slane %v650_v38, 2  ;;  %v627_v49 = vsel %vm598_vm4, %v3557_v51, 0.0 }
 0x1bc   :  { %v832_v52 = vadd.f32 1.0, %v3080_v44  ;;  %3089 = vpow2.f32 %v2779_v41  ;;  %v628_v53 = vrot.slane %v627_v49, 4  ;;  %v634_v54 = vsel %vm598_vm4, %v584_v42, 0.0 }
 0x1bd   :  { %v3082_v55 = vpop.eup %3081  ;;  %v728_v56 = vsel %vm727_vm5, %v612_v46, %v605_v35  ;;  %v646_v57 = vrot.slane %v645_v47, 1  ;;  %v652_v58 = vadd.f32 %v651_v48, %v650_v38  ;;  %v635_v59 = vrot.slane %v634_v54, 4  ;;  %v891_v46 = vpop.permute.xlu1 %890 }
 0x1be   :  { %v3084_v60 = vpop.eup %3083  ;;  %v833_v61 = vadd.f32 1.0, %v3082_v55  ;;  %3091 = vrcp.f32 %v832_v52  ;;  %v730_v63 = vsel %vm729_vm6, %v619_v29, %v728_v56  ;;  %v629_v0 = vadd.f32 %v628_v53, %v627_v49 }
 0x1bf   :  { %v3086_v1 = vpop.eup %3085  ;;  %v830_v3 = vadd.f32 1.0, %v3084_v60  ;;  %v647_v4 = vadd.f32 %v646_v57, %v645_v47  ;;  %v653_v6 = vrot.slane %v652_v58, 1  ;;  %v636_v7 = vadd.f32 %v635_v59, %v634_v54 }
 0x1c0   :  { %3093 = vrcp.f32 %v833_v61  ;;  %v831_v9 = vadd.f32 1.0, %v3086_v1  ;;  %v630_v12 = vrot.slane %v629_v0, 2  ;;  %v732_v23 = vsel %vm731_vm7, %v626_v40, %v730_v63  ;;  %v3592_v61 = vpop.permute.xlu0 %898 }
 0x1c1   :  { %3095 = vrcp.f32 %v830_v3  ;;  %v654_v28 = vadd.f32 %v653_v6, %v652_v58  ;;  %v637_v30 = vrot.slane %v636_v7, 2  ;;  %v756_v29 = vadd.f32 %v3557_v51, %v3529_v18 }
 0x1c2   :  { %3097 = vrcp.f32 %v831_v9  ;;  %v631_v33 = vadd.f32 %v630_v12, %v629_v0  ;;  %v757_v35 = vadd.f32 %v584_v42, %v3531_v19  ;;  %v587_v36 = vcombine.high %v3560_v62, %v3560_v62 }
 0x1c3   :  { %v638_v37 = vadd.f32 %v637_v30, %v636_v7  ;;  %v2776_v38 = vmul.f32 -1.442695, %v756_v29  ;;  %v669_v40 = vsel %vm598_vm4, %v3560_v62, 0.0  ;;  %v762_v41 = vadd.f32 %v3560_v62, %v3533_v20  ;;  %v893_v30 = vpop.permute.xlu1 %892 }
 0x1c4   :  { %v3088_v44 = vpop.eup %3087  ;;  %v632_v47 = vrot.slane %v631_v33, 1  ;;  %v2777_v51 = vmul.f32 -1.442695, %v757_v35  ;;  %v670_v48 = vrot.slane %v669_v40, 4  ;;  %v676_v49 = vsel %vm598_vm4, %v587_v36, 0.0 }
 0x1c5   :  { %v836_v52 = vadd.f32 1.0, %v3088_v44  ;;  %v639_v42 = vrot.slane %v638_v37, 1  ;;  %3099 = vpow2.f32 %v2776_v38  ;;  %v677_v53 = vrot.slane %v676_v49, 4 }
 0x1c6   :  { %v3090_v54 = vpop.eup %3089  ;;  %v633_v55 = vadd.f32 %v632_v47, %v631_v33  ;;  %3101 = vpow2.f32 %v2777_v51  ;;  %v671_v56 = vadd.f32 %v670_v48, %v669_v40  ;;  %v763_v57 = vadd.f32 %v587_v36, %v3535_v21 }
 0x1c7   :  { %v837_v58 = vadd.f32 1.0, %v3090_v54  ;;  %3103 = vrcp.f32 %v836_v52  ;;  %v640_v62 = vadd.f32 %v639_v42, %v638_v37  ;;  %v678_v59 = vadd.f32 %v677_v53, %v676_v49  ;;  %v3612_v52 = vpop.permute.xlu0 %894 }
 0x1c8   :  { %v3092_v60 = vpop.eup %3091  ;;  %v734_v63 = vsel %vm733_vm8, %v633_v55, %v732_v23  ;;  %v672_v0 = vrot.slane %v671_v56, 2  ;;  %v2782_v1 = vmul.f32 -1.442695, %v762_v41  ;;  %v2783_v3 = vmul.f32 -1.442695, %v763_v57 }
 0x1c9   :  { %v936_v6 = vmul.f32 %v3092_v60, %v891_v46  ;;  %3105 = vrcp.f32 %v837_v58  ;;  %v736_v7 = vsel %vm735_vm9, %v640_v62, %v734_v63  ;;  %v679_v9 = vrot.slane %v678_v59, 2 }
 0x1ca   :  { %v3094_v12 = vpop.eup %3093  ;;  %v738_v29 = vsel %vm737_vm10, %v647_v4, %v736_v7  ;;  %v673_v33 = vadd.f32 %v672_v0, %v671_v56  ;;  %3107 = vpow2.f32 %v2782_v1  ;;  %v586_v35 = vcombine.high %v3562_v2, %v3562_v2 }
 0x1cb   :  { %v3096_v36 = vpop.eup %3095  ;;  %v3599_v37 = vmul.f32 %v3094_v12, %v893_v30  ;;  %v3602_v23 = vsel %vm950_vm11, %v936_v6, 0.0  ;;  %v740_v38 = vsel %vm739_vm12, %v654_v28, %v738_v29  ;;  %v680_v40 = vadd.f32 %v679_v9, %v678_v59 }
 0x1cc   :  { %v3098_v41 = vpop.eup %3097  ;;  %v934_v46 = vmul.f32 %v3096_v36, %v3575_v50  ;;  %v3608_v4 = vadd.f32 %v740_v38, %v3505_v43  ;;  %v674_v47 = vrot.slane %v673_v33, 1  ;;  %3109 = vpow2.f32 %v2783_v3 }
 0x1cd   :  { %v935_v51 = vmul.f32 %v3098_v41, %v889_v31  ;;  %v681_v48 = vrot.slane %v680_v40, 1  ;;  %v655_v49 = vsel %vm598_vm4, %v3562_v2, 0.0  ;;  %v662_v56 = vsel %vm598_vm4, %v586_v35, 0.0 }
 0x1ce   :  { %v951_v28 = vsel %vm950_vm11, %v934_v46, 0.0  ;;  %3111 = vtanh.f32 %v3608_v4  ;;  %v3616_v42 = vadd.f32 %v674_v47, %v673_v33  ;;  %v656_v53 = vrot.slane %v655_v49, 4  ;;  %v3639_v47 = vpop.permute.xlu1 %906 }
 0x1cf   :  { %v3100_v50 = vpop.eup %3099  ;;  %v952_v54 = vrot.slane %v951_v28, 4  ;;  %v3619_v55 = vsel %vm950_vm11, %v935_v51, 0.0  ;;  %v3621_v31 = vadd.f32 %v681_v48, %v680_v40  ;;  %v663_v60 = vrot.slane %v662_v56, 4  ;;  %v897_v40 = vpop.permute.xlu0 %896 }
 0x1d0   :  { %v3102_v57 = vpop.eup %3101  ;;  %v834_v62 = vadd.f32 1.0, %v3100_v50  ;;  %v657_v59 = vadd.f32 %v656_v53, %v655_v49  ;;  %v760_v3 = vadd.f32 %v3562_v2, %v3537_v22  ;;  %v761_v6 = vadd.f32 %v586_v35, %v3539_v24 }
 0x1d1   :  { %v3625_v63 = vpop.eup %3103  ;;  %v3627_v0 = vadd.f32 %v952_v54, %v951_v28  ;;  %v835_v1 = vadd.f32 1.0, %v3102_v57  ;;  %v664_v9 = vadd.f32 %v663_v60, %v662_v56  ;;  %v589_v12 = vcombine.high %v3567_v34, %v3567_v34 }
 0x1d2   :  { %3113 = vrcp.f32 %v834_v62  ;;  %v658_v7 = vrot.slane %v657_v59, 2  ;;  %v2780_v29 = vmul.f32 -1.442695, %v760_v3  ;;  %v2781_v33 = vmul.f32 -1.442695, %v761_v6 }
 0x1d3   :  { %v3634_v30 = vpop.eup %3105  ;;  %3115 = vrcp.f32 %v835_v1  ;;  %v697_v36 = vsel %vm598_vm4, %v3567_v34, 0.0  ;;  %v665_v2 = vrot.slane %v664_v9, 2  ;;  %v704_v35 = vsel %vm598_vm4, %v589_v12, 0.0 }
 0x1d4   :  { %v3108_v38 = vpop.eup %3107  ;;  %v659_v41 = vadd.f32 %v658_v7, %v657_v59  ;;  %v698_v46 = vrot.slane %v697_v36, 4  ;;  %3117 = vpow2.f32 %v2780_v29  ;;  %v705_v48 = vrot.slane %v704_v35, 4 }
 0x1d5   :  { %v840_v51 = vadd.f32 1.0, %v3108_v38  ;;  %v766_v49 = vadd.f32 %v3567_v34, %v3541_v25  ;;  %v666_v53 = vadd.f32 %v665_v2, %v664_v9  ;;  %3119 = vpow2.f32 %v2781_v33  ;;  %v3647_v9 = vpop.permute.xlu0 %902  ;;  %v909_v38 = vpop.permute.xlu1 %908 }
 0x1d6   :  { %v660_v28 = vrot.slane %v659_v41, 1  ;;  %v699_v50 = vadd.f32 %v698_v46, %v697_v36  ;;  %v3110_v54 = vpop.eup %3109  ;;  %v706_v56 = vadd.f32 %v705_v48, %v704_v35  ;;  %v767_v57 = vadd.f32 %v589_v12, %v3549_v32 }
 0x1d7   :  { %3121 = vrcp.f32 %v840_v51  ;;  %v2786_v62 = vmul.f32 -1.442695, %v766_v49  ;;  %v841_v60 = vadd.f32 1.0, %v3110_v54  ;;  %v667_v3 = vrot.slane %v666_v53, 1 }
 0x1d8   :  { %v3112_v59 = vpop.eup %3111  ;;  %v661_v1 = vadd.f32 %v660_v28, %v659_v41  ;;  %v700_v6 = vrot.slane %v699_v50, 2  ;;  %v707_v7 = vrot.slane %v706_v56, 2  ;;  %v2787_v29 = vmul.f32 -1.442695, %v767_v57 }
 0x1d9   :  { %3123 = vpow2.f32 %v2786_v62  ;;  %v588_v34 = vcombine.high %v3569_v39, %v3569_v39  ;;  %1065 = vrot.lane.b32.xlu0 %v3112_v59, %s3359_s20  ;;  %v668_v33 = vadd.f32 %v667_v3, %v666_v53  ;;  %v683_v12 = vsel %vm598_vm4, %v3569_v39, 0.0  ;;  %v901_v44 = vpop.permute.xlu0 %900 }
 0x1da   :  { %3125 = vrcp.f32 %v841_v60  ;;  %v701_v36 = vadd.f32 %v700_v6, %v699_v50  ;;  %v708_v41 = vadd.f32 %v707_v7, %v706_v56  ;;  %v684_v2 = vrot.slane %v683_v12, 4 }
 0x1db   :  { %3127 = vpow2.f32 %v2787_v29  ;;  %v690_v46 = vsel %vm598_vm4, %v588_v34, 0.0  ;;  %v741_v51 = vsel %vm727_vm5, %v668_v33, %v661_v1  ;;  %v764_v28 = vadd.f32 %v3569_v39, %v3543_v26 }
 0x1dc   :  { %v3114_v35 = vpop.eup %3113  ;;  %v702_v48 = vrot.slane %v701_v36, 1  ;;  %v691_v49 = vrot.slane %v690_v46, 4  ;;  %v742_v50 = vsel %vm729_vm6, %v3616_v42, %v741_v51  ;;  %v709_v57 = vrot.slane %v708_v41, 1 }
 0x1dd   :  { %v3116_v54 = vpop.eup %3115  ;;  %v938_v53 = vmul.f32 %v3114_v35, %v3612_v52  ;;  %v685_v56 = vadd.f32 %v684_v2, %v683_v12  ;;  %v743_v60 = vsel %vm731_vm7, %v3621_v31, %v742_v50  ;;  %v765_v1 = vadd.f32 %v588_v34, %v3545_v27  ;;  %v905_v12 = vpop.permute.xlu1 %904 }
 0x1de   :  { %v703_v62 = vadd.f32 %v702_v48, %v701_v36  ;;  %v692_v59 = vadd.f32 %v691_v49, %v690_v46  ;;  %v3118_v3 = vpop.eup %3117  ;;  %v710_v6 = vadd.f32 %v709_v57, %v708_v41  ;;  %v2784_v29 = vmul.f32 -1.442695, %v764_v28 }
 0x1df   :  { %v686_v7 = vrot.slane %v685_v56, 2  ;;  %v939_v39 = vmul.f32 %v3116_v54, %v897_v40  ;;  %v3120_v33 = vpop.eup %3119  ;;  %v838_v52 = vadd.f32 1.0, %v3118_v3  ;;  %v2785_v58 = vmul.f32 -1.442695, %v765_v1 }
 0x1e0   :  { %v693_v35 = vrot.slane %v692_v59, 2  ;;  %v940_v42 = vmul.f32 %v3625_v63, %v3592_v61  ;;  %v839_v2 = vadd.f32 1.0, %v3120_v33  ;;  %3129 = vpow2.f32 %v2784_v29 }
 0x1e1   :  { %v3122_v36 = vpop.eup %3121  ;;  %v687_v46 = vadd.f32 %v686_v7, %v685_v56  ;;  %v3664_v31 = vmul.f32 %v3634_v30, %v901_v44  ;;  %3131 = vrcp.f32 %v838_v52  ;;  %v954_v41 = vrot.slane %v3627_v0, 2 }
 0x1e2   :  { %v944_v34 = vmul.f32 %v3122_v36, %v3639_v47  ;;  %v694_v40 = vadd.f32 %v693_v35, %v692_v59  ;;  %3133 = vrcp.f32 %v839_v2  ;;  %v4251_v61 = vrot.slane %v3619_v55, 4 }
 0x1e3   :  { %v3124_v51 = vpop.eup %3123  ;;  %v688_v48 = vrot.slane %v687_v46, 1  ;;  %v4252_v49 = vrot.slane %v3602_v23, 4  ;;  %3135 = vpow2.f32 %v2785_v58  ;;  %v955_v1 = vadd.f32 %v954_v41, %v3627_v0 }
 0x1e4   :  { %v960_v63 = vadd.f32 %v4251_v61, %v3619_v55  ;;  %v3126_v54 = vpop.eup %3125  ;;  %v3675_v44 = vsel %vm950_vm11, %v944_v34, 0.0  ;;  %v844_v30 = vadd.f32 1.0, %v3124_v51  ;;  %v695_v47 = vrot.slane %v694_v40, 1 }
 0x1e5   :  { %v967_v28 = vadd.f32 %v4252_v49, %v3602_v23  ;;  %v3128_v50 = vpop.eup %3127  ;;  %v3677_v57 = vmul.f32 %v3126_v54, %v909_v38  ;;  %v1022_v56 = vrot.slane %v3675_v44, 4  ;;  %v689_v59 = vadd.f32 %v688_v48, %v687_v46  ;;  %v3681_v23 = vpop.permute.xlu1 %910 }
 0x1e6   :  { %v845_v55 = vadd.f32 1.0, %v3128_v50  ;;  %3137 = vrcp.f32 %v844_v30  ;;  %v696_v3 = vadd.f32 %v695_v47, %v694_v40  ;;  %v961_v7 = vrot.slane %v960_v63, 2 }
 0x1e7   :  { %v744_v29 = vsel %vm733_vm8, %v689_v59, %v743_v60  ;;  %v956_v33 = vrot.slane %v955_v1, 1  ;;  %v968_v52 = vrot.slane %v967_v28, 2  ;;  %v972_v58 = vsel %vm950_vm11, %v3599_v37, 0.0 }
 0x1e8   :  { %3139 = vrcp.f32 %v845_v55  ;;  %v745_v38 = vsel %vm735_vm9, %v696_v3, %v744_v29  ;;  %v962_v35 = vadd.f32 %v961_v7, %v960_v63  ;;  %v973_v36 = vrot.slane %v972_v58, 4 }
 0x1e9   :  { %v746_v0 = vsel %vm737_vm10, %v703_v62, %v745_v38  ;;  %v957_v2 = vadd.f32 %v956_v33, %v955_v1  ;;  %v969_v46 = vadd.f32 %v968_v52, %v967_v28  ;;  %v979_v34 = vsel %vm950_vm11, %v938_v53, 0.0  ;;  %v3695_v50 = vpop.permute.xlu1 %912 }
 0x1ea   :  { %v747_v40 = vsel %vm739_vm12, %v710_v6, %v746_v0  ;;  %v963_v41 = vrot.slane %v962_v35, 1  ;;  %v974_v60 = vadd.f32 %v973_v36, %v972_v58  ;;  %v980_v51 = vrot.slane %v979_v34, 4  ;;  %v3130_v48 = vpop.eup %3129 }
 0x1eb   :  { %v3691_v61 = vadd.f32 %v747_v40, %v3508_v45  ;;  %v970_v37 = vrot.slane %v969_v46, 1  ;;  %v986_v49 = vsel %vm950_vm11, %v939_v39, 0.0  ;;  %v993_v63 = vsel %vm950_vm11, %v940_v42, 0.0  ;;  %v3132_v54 = vpop.eup %3131 }
 0x1ec   :  { %v842_v62 = vadd.f32 1.0, %v3130_v48  ;;  %v964_v30 = vadd.f32 %v963_v41, %v962_v35  ;;  %v975_v28 = vrot.slane %v974_v60, 2  ;;  %v981_v47 = vadd.f32 %v980_v51, %v979_v34  ;;  %v3134_v53 = vpop.eup %3133 }
 0x1ed   :  { %v942_v6 = vmul.f32 %v3132_v54, %v3647_v9  ;;  %3141 = vtanh.f32 %v3691_v61  ;;  %v971_v59 = vadd.f32 %v970_v37, %v969_v46  ;;  %v987_v1 = vrot.slane %v986_v49, 4  ;;  %v3136_v55 = vpop.eup %3135  ;;  %v917_v48 = vpop.permute.xlu1 %916 }
 0x1ee   :  { %v943_v3 = vmul.f32 %v3134_v53, %v905_v12  ;;  %3143 = vrcp.f32 %v842_v62  ;;  %v976_v39 = vadd.f32 %v975_v28, %v974_v60  ;;  %v982_v7 = vrot.slane %v981_v47, 2  ;;  %v915_v37 = vpop.permute.xlu0 %914 }
 0x1ef   :  { %v1007_v42 = vsel %vm950_vm11, %v942_v6, 0.0  ;;  %v843_v29 = vadd.f32 1.0, %v3136_v55  ;;  %v988_v33 = vadd.f32 %v987_v1, %v986_v49  ;;  %v994_v52 = vrot.slane %v993_v63, 4 }
 0x1f0   :  { %v3138_v58 = vpop.eup %3137  ;;  %v1008_v38 = vrot.slane %v1007_v42, 4  ;;  %v1014_v35 = vsel %vm950_vm11, %v943_v3, 0.0  ;;  %v977_v36 = vrot.slane %v976_v39, 1  ;;  %v983_v9 = vadd.f32 %v982_v7, %v981_v47 }
 0x1f1   :  { %v1015_v0 = vrot.slane %v1014_v35, 4  ;;  %3145 = vrcp.f32 %v843_v29  ;;  %v989_v46 = vrot.slane %v988_v33, 2  ;;  %v995_v34 = vadd.f32 %v994_v52, %v993_v63 }
 0x1f2   :  { %v3140_v40 = vpop.eup %3139  ;;  %v1009_v12 = vadd.f32 %v1008_v38, %v1007_v42  ;;  %v978_v41 = vadd.f32 %v977_v36, %v976_v39  ;;  %v984_v60 = vrot.slane %v983_v9, 1  ;;  %v1000_v51 = vsel %vm950_vm11, %v3664_v31, 0.0 }
 0x1f3   :  { %v990_v49 = vadd.f32 %v989_v46, %v988_v33  ;;  %v996_v54 = vrot.slane %v995_v34, 2  ;;  %v1001_v62 = vrot.slane %v1000_v51, 4  ;;  %v1089_v28 = vsel %vm727_vm5, %v964_v30, %v957_v2 }
 0x1f4   :  { %v985_v53 = vadd.f32 %v984_v60, %v983_v9  ;;  %v1090_v47 = vsel %vm729_vm6, %v971_v59, %v1089_v28  ;;  %v948_v6 = vmul.f32 %v3138_v58, %v915_v37  ;;  %v949_v1 = vmul.f32 %v3140_v40, %v917_v48 }
 0x1f5   :  { %v991_v63 = vrot.slane %v990_v49, 1  ;;  %v997_v55 = vadd.f32 %v996_v54, %v995_v34  ;;  %v1002_v3 = vadd.f32 %v1001_v62, %v1000_v51  ;;  %v1091_v39 = vsel %vm731_vm7, %v978_v41, %v1090_v47 }
 0x1f6   :  { %v1092_v7 = vsel %vm733_vm8, %v985_v53, %v1091_v39  ;;  %v1010_v31 = vrot.slane %v1009_v12, 2  ;;  %v1016_v42 = vadd.f32 %v1015_v0, %v1014_v35  ;;  %v1023_v29 = vadd.f32 %v1022_v56, %v3675_v44 }
 0x1f7   :  { %v3142_v33 = vpop.eup %3141  ;;  %v992_v2 = vadd.f32 %v991_v63, %v990_v49  ;;  %v998_v30 = vrot.slane %v997_v55, 1  ;;  %v1003_v52 = vrot.slane %v1002_v3, 2  ;;  %v1028_v59 = vsel %vm950_vm11, %v3677_v57, 0.0 }
 0x1f8   :  { %v3144_v58 = vpop.eup %3143  ;;  %1067 = vrot.lane.b32.xlu1 %v3142_v33, %s3359_s20  ;;  %v1011_v38 = vadd.f32 %v1010_v31, %v1009_v12  ;;  %v1017_v36 = vrot.slane %v1016_v42, 2  ;;  %v1024_v9 = vrot.slane %v1023_v29, 2  ;;  %v1029_v46 = vrot.slane %v1028_v59, 4 }
 0x1f9   :  { %v946_v35 = vmul.f32 %v3144_v58, %v3681_v23  ;;  %v999_v0 = vadd.f32 %v998_v30, %v997_v55  ;;  %v1004_v34 = vadd.f32 %v1003_v52, %v1002_v3  ;;  %v1093_v44 = vsel %vm735_vm9, %v992_v2, %v1092_v7 }
 0x1fa   :  { %v1012_v56 = vrot.slane %v1011_v38, 1  ;;  %v1018_v40 = vadd.f32 %v1017_v36, %v1016_v42  ;;  %v1025_v41 = vadd.f32 %v1024_v9, %v1023_v29  ;;  %v1030_v60 = vadd.f32 %v1029_v46, %v1028_v59 }
 0x1fb   :  { %v3146_v51 = vpop.eup %3145  ;;  %v1005_v48 = vrot.slane %v1004_v34, 1  ;;  %v1094_v57 = vsel %vm737_vm10, %v999_v0, %v1093_v44  ;;  %v1035_v37 = vsel %vm950_vm11, %v946_v35, 0.0  ;;  %v1049_v12 = vsel %vm950_vm11, %v948_v6, 0.0 }
 0x1fc   :  { %v947_v49 = vmul.f32 %v3146_v51, %v3695_v50  ;;  %v1013_v54 = vadd.f32 %v1012_v56, %v1011_v38  ;;  %v1019_v23 = vrot.slane %v1018_v40, 1  ;;  %v1026_v62 = vrot.slane %v1025_v41, 1 }
 0x1fd   :  { %v1006_v28 = vadd.f32 %v1005_v48, %v1004_v34  ;;  %v1031_v53 = vrot.slane %v1030_v60, 2  ;;  %v1036_v47 = vrot.slane %v1035_v37, 4  ;;  %v1050_v63 = vrot.slane %v1049_v12, 4 }
 0x1fe   :  { %v1020_v55 = vadd.f32 %v1019_v23, %v1018_v40  ;;  %v1027_v3 = vadd.f32 %v1026_v62, %v1025_v41  ;;  %v1042_v39 = vsel %vm950_vm11, %v947_v49, 0.0  ;;  %v1056_v7 = vsel %vm950_vm11, %v949_v1, 0.0 }
 0x1ff   :  { %v1095_v31 = vsel %vm739_vm12, %v1006_v28, %v1094_v57  ;;  %v1032_v42 = vadd.f32 %v1031_v53, %v1030_v60  ;;  %v1037_v29 = vadd.f32 %v1036_v47, %v1035_v37  ;;  %v1043_v6 = vrot.slane %v1042_v39, 4 }
 0x200   :  { %1103 = vrot.lane.b32.xlu0 %v1095_v31, %s3361_s3  ;;  %v1051_v50 = vadd.f32 %v1050_v63, %v1049_v12  ;;  %v1057_v33 = vrot.slane %v1056_v7, 4  ;;  %v1096_v2 = vsel %vm727_vm5, %v1020_v55, %v1013_v54  ;;  %v2770_v28 = vmul.f32 -1.442695, %v3608_v4 }
 0x201   :  { %v1033_v30 = vrot.slane %v1032_v42, 1  ;;  %v1038_v52 = vrot.slane %v1037_v29, 2  ;;  %v1044_v59 = vadd.f32 %v1043_v6, %v1042_v39  ;;  %v1097_v58 = vsel %vm729_vm6, %v1027_v3, %v1096_v2 }
 0x202   :  { %v1052_v38 = vrot.slane %v1051_v50, 2  ;;  %v1058_v36 = vadd.f32 %v1057_v33, %v1056_v7  ;;  %3147 = vpow2.f32 %v2770_v28  ;;  %v2771_v47 = vmul.f32 -1.442695, %v3691_v61 }
 0x203   :  { %v1034_v1 = vadd.f32 %v1033_v30, %v1032_v42  ;;  %v1039_v9 = vadd.f32 %v1038_v52, %v1037_v29  ;;  %v1045_v46 = vrot.slane %v1044_v59, 2 }
 0x204   :  { %v1053_v35 = vadd.f32 %v1052_v38, %v1051_v50  ;;  %v1059_v0 = vrot.slane %v1058_v36, 2  ;;  %3149 = vpow2.f32 %v2771_v47 }
 0x205   :  { %v1040_v34 = vrot.slane %v1039_v9, 1  ;;  %v1046_v44 = vadd.f32 %v1045_v46, %v1044_v59  ;;  %v1098_v56 = vsel %vm731_vm7, %v1034_v1, %v1097_v58 }
 0x206   :  { %v1054_v40 = vrot.slane %v1053_v35, 1  ;;  %v1060_v41 = vadd.f32 %v1059_v0, %v1058_v36 }
 0x207   :  { %v1041_v60 = vadd.f32 %v1040_v34, %v1039_v9  ;;  %v1047_v51 = vrot.slane %v1046_v44, 1 }
 0x208   :  { %v1061_v48 = vrot.slane %v1060_v41, 1  ;;  %v1055_v12 = vadd.f32 %v1054_v40, %v1053_v35  ;;  %v3320_v40 = vld [vmem:[%s4246_s1 + $0x10] sm:$0xff] }
 0x209   :  { %v1048_v57 = vadd.f32 %v1047_v51, %v1046_v44  ;;  %v1099_v37 = vsel %vm733_vm8, %v1041_v60, %v1098_v56  ;;  %v3319_v56 = vld [vmem:[%s4246_s1 + $0x8] sm:$0xff]  ;;  %v3322_v60 = vld [vmem:[%s4246_s1 + $0x20] sm:$0xff] }
 0x20a   :  { %v1062_v49 = vadd.f32 %v1061_v48, %v1060_v41  ;;  %v3321_v41 = vld [vmem:[%s4246_s1 + $0x18] sm:$0xff]  ;;  %v3323_v51 = vld [vmem:[%s4246_s1 + $0x28] sm:$0xff]  ;;  %v3324_v48 = vld [vmem:[%s4246_s1 + $0x30] sm:$0xff] }
 0x20b   :  { %v1100_v54 = vsel %vm735_vm9, %v1048_v57, %v1099_v37  ;;  %v3325_v57 = vld [vmem:[%s4246_s1 + $0x38] sm:$0xff]  ;;  %v3326_v37 = vld [vmem:[%s4246_s1] sm:$0xff] }
 0x20c   :  { %v1101_v23 = vsel %vm737_vm10, %v1055_v12, %v1100_v54  ;;  %v3148_v53 = vpop.eup %3147 }
 0x20d   :  { %v1102_v62 = vsel %vm739_vm12, %v1062_v49, %v1101_v23  ;;  %v774_v63 = vadd.f32 1.0, %v3148_v53 }
 0x20e   :  { %1105 = vrot.lane.b32.xlu1 %v1102_v62, %s3361_s3  ;;  %v3150_v55 = vpop.eup %3149 }
 0x20f   :  { %3151 = vrcp.f32 %v774_v63  ;;  %v775_v7 = vadd.f32 1.0, %v3150_v55 }
 0x211   :  { %3153 = vrcp.f32 %v775_v7 }
 0x219   :  { %v3152_v39 = vpop.eup %3151 }
 0x21b   :  { %v3154_v50 = vpop.eup %3153 }
 0x24b   :  { %v1066_v3 = vpop.permute.xlu0 %1065 }
 0x24c   :  { %v1071_v31 = vmul.f32 %v3152_v39, %v1066_v3 }
 0x26a   :  { %v1068_v6 = vpop.permute.xlu1 %1067 }
 0x26b   :  { %v1072_v4 = vmul.f32 %v3154_v50, %v1068_v6 }
 0x272   :  { %v1104_v42 = vpop.permute.xlu0 %1103 }
 0x273   :  { %v1109_v29 = vadd.f32 %v1104_v42, %v1071_v31 }
 0x275   :  { %3155 = vtanh.f32 %v1109_v29 }
 0x27f   :  { %v3156_v33 = vpop.eup %3155 }
 0x280   :  { %v1106_v2 = vpop.permute.xlu1 %1105  ;;  %1115 = vrot.lane.b32.xlu0 %v3156_v33, %s3361_s3 }
 0x281   :  { %v1110_v61 = vadd.f32 %v1106_v2, %v1072_v4 }
 0x283   :  { %3157 = vtanh.f32 %v1110_v61 }
 0x28d   :  { %v3158_v30 = vpop.eup %3157 }
 0x28e   :  { %1117 = vrot.lane.b32.xlu1 %v3158_v30, %s3361_s3 }
 0x292   :  { %1133 = vrot.lane.b32.xlu1 %v1109_v29, %s3361_s3 }
 0x296   :  { %1135 = vrot.lane.b32.xlu1 %v1110_v61, %s3361_s3 }
 0x2f2   :  { %v1116_v52 = vpop.permute.xlu0 %1115 }
 0x2f3   :  { %v1121_v59 = vmul.f32 %v3152_v39, %v1116_v52 }
 0x2f5   :  { %1125 = vrot.lane.b32.xlu0 %v1121_v59, %s3362_s23 }
 0x300   :  { %v1118_v58 = vpop.permute.xlu1 %1117 }
 0x301   :  { %v1122_v38 = vmul.f32 %v3154_v50, %v1118_v58 }
 0x303   :  { %1127 = vrot.lane.b32.xlu0 %v1122_v38, %s3362_s23 }
 0x304   :  { %v1134_v36 = vpop.permute.xlu1 %1133 }
 0x308   :  { %v1136_v46 = vpop.permute.xlu1 %1135 }
 0x367   :  { %v1126_v1 = vpop.permute.xlu0 %1125 }
 0x368   :  { %v1139_v9 = vsel %vm444_vm3, %v1126_v1, %v1134_v36 }
 0x369   :  { %v1141_v35 = vmul.f32 %v3435_v13, %v1139_v9 }
 0x375   :  { %v1128_v0 = vpop.permute.xlu0 %1127 }
 0x376   :  { %v1140_v34 = vsel %vm444_vm3, %v1128_v0, %v1136_v46 }
 0x377   :  { %v3043_v44 = vpack.c.bf16 %v1140_v34, %v1141_v35 }
 0x379   :  { %3044 = vmatprep.subr.bf16.mxu1 %v3043_v44 }
 0x37a   :  { %3046 = vmatpush3.bf16.msra.mxu1 %v3043_v44 }
 0x37d   :  { %2968 = vmatmul.mubr.msk.f32.vlgmr.msra.gmra.mrb[10].mxu1 %vm314_vm0, %v3319_v56 }
 0x37e   :  { %2970 = vmatprep.mubr.msk.f32.mxu1 %vm314_vm0, %v3320_v40 }
 0x381   :  { %2971 = vmatmul.mubr.msk.f32.gmra.mrb[12].mxu1 %vm314_vm0, %v3321_v41 }
 0x382   :  { %2973 = vmatprep.mubr.msk.f32.mxu1 %vm314_vm0, %v3322_v60 }
 0x385   :  { %2974 = vmatmul.mubr.msk.f32.gmra.mrb[14].mxu1 %vm314_vm0, %v3323_v51 }
 0x386   :  { %2976 = vmatprep.mubr.msk.f32.mxu1 %vm314_vm0, %v3324_v48 }
 0x389   :  { %2977 = vmatmul.mubr.msk.f32.gmra.mrb[16].mxu1 %vm314_vm0, %v3325_v57 }
 0x38a   :  { %3003 = vmatprep.mubr.msk.f32.mxu1 %vm314_vm0, %v3326_v37 }
 0x450   :  { %v2969_v12 = vpop.f32.mrb[10].mxu1 }
 0x451   :  { %v1674_v49 = vcombine.high %v2969_v12, %v2969_v12  ;;  %1685 = vrot.lane.b32.xlu0 %v2969_v12, %s3359_s20  ;;  %v1209_v54 = vpop.f32.mrb[11].mxu1 }
 0x452   :  { %2987 = vmatprep.mubr.msk.f32.mxu0 %vm444_vm3, %v1209_v54  ;;  %v1673_v62 = vcombine.high %v1209_v54, %v1209_v54 }
 0x453   :  { %1687 = vrot.lane.b32.xlu1 %v1674_v49, %s3359_s20  ;;  %2988 = vmatmul.mubr.msk.f32.vlgmr.msra.gmra.mrb[8].mxu0 %vm444_vm3, %v2969_v12 }
 0x454   :  { %v2972_v23 = vpop.f32.mrb[12].mxu1  ;;  %3062 = vmatpush3.bf16.msra.mxu0 %v3441_v15 }
 0x455   :  { %1681 = vrot.lane.b32.xlu0 %v1209_v54, %s3359_s20  ;;  %v1219_v28 = vpop.f32.mrb[13].mxu1  ;;  %3064 = vmatprep.subr.bf16.mxu0 %v3447_v17  ;;  %v1676_v39 = vcombine.high %v2972_v23, %v2972_v23 }
 0x456   :  { %2990 = vmatprep.mubr.msk.f32.mxu0 %vm444_vm3, %v1219_v28  ;;  %v1675_v3 = vcombine.high %v1219_v28, %v1219_v28 }
 0x457   :  { %1683 = vrot.lane.b32.xlu1 %v1673_v62, %s3359_s20  ;;  %2991 = vmatmul.mubr.msk.f32.gmra.mrb[10].mxu0 %vm444_vm3, %v2972_v23 }
 0x458   :  { %v2975_v53 = vpop.f32.mrb[14].mxu1  ;;  %3066 = vmatpush3.bf16.msra.mxu0 %v3447_v17 }
 0x459   :  { %1693 = vrot.lane.b32.xlu0 %v2972_v23, %s3359_s20  ;;  %v1229_v47 = vpop.f32.mrb[15].mxu1  ;;  %v1678_v63 = vcombine.high %v2975_v53, %v2975_v53 }
 0x45a   :  { %2993 = vmatprep.mubr.msk.f32.mxu0 %vm444_vm3, %v1229_v47  ;;  %v1677_v17 = vcombine.high %v1229_v47, %v1229_v47 }
 0x45b   :  { %1701 = vrot.lane.b32.xlu1 %v2975_v53, %s3359_s20  ;;  %2994 = vmatmul.mubr.msk.f32.gmra.mrb[12].mxu0 %vm444_vm3, %v2975_v53 }
 0x45c   :  { %v2978_v15 = vpop.f32.mrb[16].mxu1 }
 0x45d   :  { %1689 = vrot.lane.b32.xlu0 %v1219_v28, %s3359_s20  ;;  %v1239_v55 = vpop.f32.mrb[17].mxu1  ;;  %v1680_v31 = vcombine.high %v2978_v15, %v2978_v15 }
 0x45e   :  { %2996 = vmatprep.mubr.msk.f32.mxu0 %vm444_vm3, %v1239_v55  ;;  %v1679_v7 = vcombine.high %v1239_v55, %v1239_v55 }
 0x45f   :  { %1703 = vrot.lane.b32.xlu1 %v1678_v63, %s3359_s20  ;;  %2997 = vmatmul.mubr.msk.f32.gmra.mrb[14].mxu0 %vm444_vm3, %v2978_v15 }
 0x461   :  { %1691 = vrot.lane.b32.xlu0 %v1675_v3, %s3359_s20 }
 0x463   :  { %1699 = vrot.lane.b32.xlu1 %v1677_v17, %s3359_s20 }
 0x465   :  { %1697 = vrot.lane.b32.xlu0 %v1229_v47, %s3359_s20 }
 0x467   :  { %1705 = vrot.lane.b32.xlu1 %v1239_v55, %s3359_s20 }
 0x469   :  { %1695 = vrot.lane.b32.xlu0 %v1676_v39, %s3359_s20 }
 0x46b   :  { %1707 = vrot.lane.b32.xlu1 %v1679_v7, %s3359_s20 }
 0x46d   :  { %1709 = vrot.lane.b32.xlu0 %v2978_v15, %s3359_s20 }
 0x46f   :  { %1711 = vrot.lane.b32.xlu1 %v1680_v31, %s3359_s20 }
 0x526   :  { %v2989_v42 = vpop.f32.mrb[8].mxu0 }
 0x527   :  { %v1386_v29 = vcombine.high %v2989_v42, %v2989_v42  ;;  %v1415_v6 = vsel %vm598_vm4, %v2989_v42, 0.0  ;;  %v1549_v50 = vadd.f32 %v2989_v42, %v3517_v8  ;;  %v1338_v33 = vpop.f32.mrb[9].mxu0 }
 0x528   :  { %v1416_v4 = vrot.slane %v1415_v6, 4  ;;  %v1385_v2 = vcombine.high %v1338_v33, %v1338_v33  ;;  %v1401_v61 = vsel %vm598_vm4, %v1338_v33, 0.0  ;;  %v1547_v30 = vadd.f32 %v1338_v33, %v3521_v11 }
 0x529   :  { %v1422_v52 = vsel %vm598_vm4, %v1386_v29, 0.0  ;;  %v1550_v59 = vadd.f32 %v1386_v29, %v3519_v10  ;;  %v2808_v58 = vmul.f32 -1.442695, %v1549_v50  ;;  %v1402_v38 = vrot.slane %v1401_v61, 4 }
 0x52a   :  { %v1417_v36 = vadd.f32 %v1416_v4, %v1415_v6  ;;  %v1423_v1 = vrot.slane %v1422_v52, 4  ;;  %v1408_v9 = vsel %vm598_vm4, %v1385_v2, 0.0  ;;  %v1548_v46 = vadd.f32 %v1385_v2, %v3523_v14  ;;  %v2992_v35 = vpop.f32.mrb[10].mxu0 }
 0x52b   :  { %3159 = vpow2.f32 %v2808_v58  ;;  %v2809_v0 = vmul.f32 -1.442695, %v1550_v59  ;;  %v1403_v34 = vadd.f32 %v1402_v38, %v1401_v61  ;;  %v1409_v44 = vrot.slane %v1408_v9, 4  ;;  %v3809_v56 = vpop.f32.mrb[11].mxu0 }
 0x52c   :  { %v1418_v40 = vrot.slane %v1417_v36, 2  ;;  %v1424_v41 = vadd.f32 %v1423_v1, %v1422_v52  ;;  %v2806_v60 = vmul.f32 -1.442695, %v1547_v30  ;;  %v2807_v51 = vmul.f32 -1.442695, %v1548_v46 }
 0x52d   :  { %3161 = vpow2.f32 %v2809_v0  ;;  %v1404_v48 = vrot.slane %v1403_v34, 2  ;;  %v1410_v57 = vadd.f32 %v1409_v44, %v1408_v9  ;;  %v1388_v37 = vcombine.high %v2992_v35, %v2992_v35  ;;  %v1686_v0 = vpop.permute.xlu0 %1685 }
 0x52e   :  { %v1419_v12 = vadd.f32 %v1418_v40, %v1417_v36  ;;  %v1425_v49 = vrot.slane %v1424_v41, 2  ;;  %3163 = vpow2.f32 %v2806_v60  ;;  %v1443_v54 = vsel %vm598_vm4, %v2992_v35, 0.0  ;;  %v3812_v23 = vpop.f32.mrb[12].mxu0 }
 0x52f   :  { %v1405_v62 = vadd.f32 %v1404_v48, %v1403_v34  ;;  %v1411_v28 = vrot.slane %v1410_v57, 2  ;;  %3165 = vpow2.f32 %v2807_v51  ;;  %v1444_v53 = vrot.slane %v1443_v54, 4  ;;  %v3814_v47 = vpop.f32.mrb[13].mxu0 }
 0x530   :  { %v1420_v15 = vrot.slane %v1419_v12, 1  ;;  %v1426_v63 = vadd.f32 %v1425_v49, %v1424_v41  ;;  %v1450_v55 = vsel %vm598_vm4, %v1388_v37, 0.0  ;;  %v1553_v3 = vadd.f32 %v2992_v35, %v3525_v5 }
 0x531   :  { %v1406_v17 = vrot.slane %v1405_v62, 1  ;;  %v1412_v39 = vadd.f32 %v1411_v28, %v1410_v57  ;;  %v1445_v7 = vadd.f32 %v1444_v53, %v1443_v54  ;;  %v1451_v31 = vrot.slane %v1450_v55, 4 }
 0x532   :  { %v1421_v42 = vadd.f32 %v1420_v15, %v1419_v12  ;;  %v1427_v29 = vrot.slane %v1426_v63, 1  ;;  %v1554_v6 = vadd.f32 %v1388_v37, %v3527_v16  ;;  %v2812_v50 = vmul.f32 -1.442695, %v1553_v3  ;;  %v3819_v33 = vpop.f32.mrb[14].mxu0 }
 0x533   :  { %v1407_v4 = vadd.f32 %v1406_v17, %v1405_v62  ;;  %v1413_v2 = vrot.slane %v1412_v39, 1  ;;  %v1446_v61 = vrot.slane %v1445_v7, 2  ;;  %v1452_v30 = vadd.f32 %v1451_v31, %v1450_v55  ;;  %v3821_v52 = vpop.f32.mrb[15].mxu0 }
 0x534   :  { %v1428_v59 = vadd.f32 %v1427_v29, %v1426_v63  ;;  %3167 = vpow2.f32 %v2812_v50  ;;  %v2813_v58 = vmul.f32 -1.442695, %v1554_v6  ;;  %v1387_v38 = vcombine.high %v3809_v56, %v3809_v56  ;;  %v1682_v29 = vpop.permute.xlu0 %1681 }
 0x535   :  { %v3160_v36 = vpop.eup %3159  ;;  %v1414_v1 = vadd.f32 %v1413_v2, %v1412_v39  ;;  %v1447_v9 = vadd.f32 %v1446_v61, %v1445_v7  ;;  %v1453_v46 = vrot.slane %v1452_v30, 2  ;;  %v1429_v35 = vsel %vm598_vm4, %v3809_v56, 0.0 }
 0x536   :  { %v1627_v34 = vadd.f32 1.0, %v3160_v36  ;;  %3169 = vpow2.f32 %v2813_v58  ;;  %v1430_v44 = vrot.slane %v1429_v35, 4  ;;  %v1436_v40 = vsel %vm598_vm4, %v1387_v38, 0.0 }
 0x537   :  { %v3162_v41 = vpop.eup %3161  ;;  %v1529_v60 = vsel %vm727_vm5, %v1414_v1, %v1407_v4  ;;  %v1448_v51 = vrot.slane %v1447_v9, 1  ;;  %v1454_v48 = vadd.f32 %v1453_v46, %v1452_v30  ;;  %v1437_v57 = vrot.slane %v1436_v40, 4 }
 0x538   :  { %v3164_v37 = vpop.eup %3163  ;;  %v1628_v12 = vadd.f32 1.0, %v3162_v41  ;;  %3171 = vrcp.f32 %v1627_v34  ;;  %v1530_v49 = vsel %vm729_vm6, %v1421_v42, %v1529_v60  ;;  %v1431_v54 = vadd.f32 %v1430_v44, %v1429_v35  ;;  %v1688_v34 = vpop.permute.xlu1 %1687 }
 0x539   :  { %v3166_v62 = vpop.eup %3165  ;;  %v1625_v28 = vadd.f32 1.0, %v3164_v37  ;;  %v1449_v53 = vadd.f32 %v1448_v51, %v1447_v9  ;;  %v1455_v15 = vrot.slane %v1454_v48, 1  ;;  %v1438_v63 = vadd.f32 %v1437_v57, %v1436_v40  ;;  %v3842_v57 = vpop.permute.xlu0 %1693 }
 0x53a   :  { %3173 = vrcp.f32 %v1628_v12  ;;  %v1626_v55 = vadd.f32 1.0, %v3166_v62  ;;  %v1432_v3 = vrot.slane %v1431_v54, 2  ;;  %v1531_v17 = vsel %vm731_vm7, %v1428_v59, %v1530_v49 }
 0x53b   :  { %3175 = vrcp.f32 %v1625_v28  ;;  %v1456_v39 = vadd.f32 %v1455_v15, %v1454_v48  ;;  %v1439_v7 = vrot.slane %v1438_v63, 2  ;;  %v1551_v31 = vadd.f32 %v3809_v56, %v3529_v18 }
 0x53c   :  { %3177 = vrcp.f32 %v1626_v55  ;;  %v1433_v42 = vadd.f32 %v1432_v3, %v1431_v54  ;;  %v1552_v6 = vadd.f32 %v1387_v38, %v3531_v19  ;;  %v1390_v50 = vcombine.high %v3812_v23, %v3812_v23 }
 0x53d   :  { %v1440_v4 = vadd.f32 %v1439_v7, %v1438_v63  ;;  %v2810_v2 = vmul.f32 -1.442695, %v1551_v31  ;;  %v1471_v61 = vsel %vm598_vm4, %v3812_v23, 0.0  ;;  %v1557_v30 = vadd.f32 %v3812_v23, %v3533_v20 }
 0x53e   :  { %v3168_v59 = vpop.eup %3167  ;;  %v1434_v58 = vrot.slane %v1433_v42, 1  ;;  %v2811_v36 = vmul.f32 -1.442695, %v1552_v6  ;;  %v1472_v56 = vrot.slane %v1471_v61, 4  ;;  %v1478_v1 = vsel %vm598_vm4, %v1390_v50, 0.0 }
 0x53f   :  { %v1631_v9 = vadd.f32 1.0, %v3168_v59  ;;  %v1441_v46 = vrot.slane %v1440_v4, 1  ;;  %3179 = vpow2.f32 %v2810_v2  ;;  %v1479_v38 = vrot.slane %v1478_v1, 4 }
 0x540   :  { %v3170_v35 = vpop.eup %3169  ;;  %v1435_v44 = vadd.f32 %v1434_v58, %v1433_v42  ;;  %3181 = vpow2.f32 %v2811_v36  ;;  %v1473_v40 = vadd.f32 %v1472_v56, %v1471_v61  ;;  %v1558_v41 = vadd.f32 %v1390_v50, %v3535_v21  ;;  %v3861_v56 = vpop.permute.xlu0 %1689 }
 0x541   :  { %v1632_v60 = vadd.f32 1.0, %v3170_v35  ;;  %3183 = vrcp.f32 %v1631_v9  ;;  %v1442_v23 = vadd.f32 %v1441_v46, %v1440_v4  ;;  %v1480_v51 = vadd.f32 %v1479_v38, %v1478_v1  ;;  %v1684_v4 = vpop.permute.xlu1 %1683 }
 0x542   :  { %v3172_v48 = vpop.eup %3171  ;;  %v1532_v37 = vsel %vm733_vm8, %v1435_v44, %v1531_v17  ;;  %v1474_v12 = vrot.slane %v1473_v40, 2  ;;  %v2816_v49 = vmul.f32 -1.442695, %v1557_v30  ;;  %v2817_v54 = vmul.f32 -1.442695, %v1558_v41 }
 0x543   :  { %v1731_v62 = vmul.f32 %v3172_v48, %v1686_v0  ;;  %3185 = vrcp.f32 %v1632_v60  ;;  %v1533_v28 = vsel %vm735_vm9, %v1442_v23, %v1532_v37  ;;  %v1481_v15 = vrot.slane %v1480_v51, 2 }
 0x544   :  { %v3174_v63 = vpop.eup %3173  ;;  %v1534_v55 = vsel %vm737_vm10, %v1449_v53, %v1533_v28  ;;  %v1475_v3 = vadd.f32 %v1474_v12, %v1473_v40  ;;  %3187 = vpow2.f32 %v2816_v49  ;;  %v1389_v7 = vcombine.high %v3814_v47, %v3814_v47 }
 0x545   :  { %v3176_v31 = vpop.eup %3175  ;;  %v3849_v42 = vmul.f32 %v3174_v63, %v1688_v34  ;;  %v3852_v17 = vsel %vm950_vm11, %v1731_v62, 0.0  ;;  %v1535_v0 = vsel %vm739_vm12, %v1456_v39, %v1534_v55  ;;  %v1482_v6 = vadd.f32 %v1481_v15, %v1480_v51 }
 0x546   :  { %v3178_v50 = vpop.eup %3177  ;;  %v1760_v2 = vrot.slane %v3852_v17, 4  ;;  %v1729_v61 = vmul.f32 %v3176_v31, %v1682_v29  ;;  %v3857_v53 = vadd.f32 %v1535_v0, %v3505_v43  ;;  %v1476_v30 = vrot.slane %v1475_v3, 1  ;;  %v1692_v0 = vpop.permute.xlu0 %1691 }
 0x547   :  { %v1730_v59 = vmul.f32 %v3178_v50, %v1684_v4  ;;  %v1483_v58 = vrot.slane %v1482_v6, 1  ;;  %3189 = vpow2.f32 %v2817_v54  ;;  %v1457_v36 = vsel %vm598_vm4, %v3814_v47, 0.0  ;;  %v3888_v4 = vpop.permute.xlu1 %1701 }
 0x548   :  { %v1745_v39 = vsel %vm950_vm11, %v1729_v61, 0.0  ;;  %3191 = vtanh.f32 %v3857_v53  ;;  %v3865_v1 = vadd.f32 %v1476_v30, %v1475_v3  ;;  %v1458_v9 = vrot.slane %v1457_v36, 4 }
 0x549   :  { %v3180_v29 = vpop.eup %3179  ;;  %v1746_v46 = vrot.slane %v1745_v39, 4  ;;  %v3868_v38 = vsel %vm950_vm11, %v1730_v59, 0.0  ;;  %v3870_v35 = vadd.f32 %v1483_v58, %v1482_v6  ;;  %v1464_v34 = vsel %vm598_vm4, %v1389_v7, 0.0 }
 0x54a   :  { %v3182_v44 = vpop.eup %3181  ;;  %v1753_v40 = vrot.slane %v3868_v38, 4  ;;  %v1629_v41 = vadd.f32 1.0, %v3180_v29  ;;  %v1459_v60 = vadd.f32 %v1458_v9, %v1457_v36  ;;  %v1465_v23 = vrot.slane %v1464_v34, 4 }
 0x54b   :  { %v3874_v51 = vpop.eup %3183  ;;  %v3876_v48 = vadd.f32 %v1746_v46, %v1745_v39  ;;  %v1630_v37 = vadd.f32 1.0, %v3182_v44  ;;  %v1555_v12 = vadd.f32 %v3814_v47, %v3537_v22  ;;  %v1556_v49 = vadd.f32 %v1389_v7, %v3539_v24 }
 0x54c   :  { %3193 = vrcp.f32 %v1629_v41  ;;  %v1460_v54 = vrot.slane %v1459_v60, 2  ;;  %v1466_v62 = vadd.f32 %v1465_v23, %v1464_v34  ;;  %v1392_v28 = vcombine.high %v3819_v33, %v3819_v33 }
 0x54d   :  { %v3883_v15 = vpop.eup %3185  ;;  %3195 = vrcp.f32 %v1630_v37  ;;  %v2814_v63 = vmul.f32 -1.442695, %v1555_v12  ;;  %v2815_v55 = vmul.f32 -1.442695, %v1556_v49  ;;  %v1499_v3 = vsel %vm598_vm4, %v3819_v33, 0.0 }
 0x54e   :  { %v3188_v31 = vpop.eup %3187  ;;  %v1461_v6 = vadd.f32 %v1460_v54, %v1459_v60  ;;  %v1467_v47 = vrot.slane %v1466_v62, 2  ;;  %v1500_v50 = vrot.slane %v1499_v3, 4  ;;  %v1506_v7 = vsel %vm598_vm4, %v1392_v28, 0.0  ;;  %v3896_v54 = vpop.permute.xlu0 %1697 }
 0x54f   :  { %v1635_v61 = vadd.f32 1.0, %v3188_v31  ;;  %3197 = vpow2.f32 %v2814_v63  ;;  %v1507_v30 = vrot.slane %v1506_v7, 4  ;;  %v1561_v59 = vadd.f32 %v3819_v33, %v3541_v25 }
 0x550   :  { %v1462_v58 = vrot.slane %v1461_v6, 1  ;;  %v1468_v36 = vadd.f32 %v1467_v47, %v1466_v62  ;;  %3199 = vpow2.f32 %v2815_v55  ;;  %v1501_v39 = vadd.f32 %v1500_v50, %v1499_v3  ;;  %v1704_v55 = vpop.permute.xlu1 %1703 }
 0x551   :  { %v3190_v9 = vpop.eup %3189  ;;  %3201 = vrcp.f32 %v1635_v61  ;;  %v1508_v29 = vadd.f32 %v1507_v30, %v1506_v7  ;;  %v1562_v46 = vadd.f32 %v1392_v28, %v3549_v32  ;;  %v2820_v34 = vmul.f32 -1.442695, %v1561_v59 }
 0x552   :  { %v3192_v44 = vpop.eup %3191  ;;  %v1636_v41 = vadd.f32 1.0, %v3190_v9  ;;  %v1463_v60 = vadd.f32 %v1462_v58, %v1461_v6  ;;  %v1469_v23 = vrot.slane %v1468_v36, 1  ;;  %v1502_v37 = vrot.slane %v1501_v39, 2 }
 0x553   :  { %v1509_v12 = vrot.slane %v1508_v29, 2  ;;  %3203 = vpow2.f32 %v2820_v34  ;;  %v2821_v49 = vmul.f32 -1.442695, %v1562_v46  ;;  %v1391_v33 = vcombine.high %v3821_v52, %v3821_v52  ;;  %1859 = vrot.lane.b32.xlu0 %v3192_v44, %s3359_s20 }
 0x554   :  { %3205 = vrcp.f32 %v1636_v41  ;;  %v1470_v62 = vadd.f32 %v1469_v23, %v1468_v36  ;;  %v1503_v63 = vadd.f32 %v1502_v37, %v1501_v39  ;;  %v1485_v28 = vsel %vm598_vm4, %v3821_v52, 0.0 }
 0x555   :  { %v1510_v3 = vadd.f32 %v1509_v12, %v1508_v29  ;;  %3207 = vpow2.f32 %v2821_v49  ;;  %v1486_v31 = vrot.slane %v1485_v28, 4  ;;  %v1492_v6 = vsel %vm598_vm4, %v1391_v33, 0.0  ;;  %v1696_v49 = vpop.permute.xlu0 %1695 }
 0x556   :  { %v3194_v47 = vpop.eup %3193  ;;  %v1536_v50 = vsel %vm727_vm5, %v1470_v62, %v1463_v60  ;;  %v1504_v7 = vrot.slane %v1503_v63, 1  ;;  %v1493_v61 = vrot.slane %v1492_v6, 4  ;;  %v1559_v30 = vadd.f32 %v3821_v52, %v3543_v26 }
 0x557   :  { %v3196_v59 = vpop.eup %3195  ;;  %v1733_v58 = vmul.f32 %v3194_v47, %v3861_v56  ;;  %v1537_v36 = vsel %vm729_vm6, %v3865_v1, %v1536_v50  ;;  %v1511_v39 = vrot.slane %v1510_v3, 1  ;;  %v1487_v9 = vadd.f32 %v1486_v31, %v1485_v28  ;;  %v1700_v28 = vpop.permute.xlu1 %1699 }
 0x558   :  { %v1505_v29 = vadd.f32 %v1504_v7, %v1503_v63  ;;  %v1494_v46 = vadd.f32 %v1493_v61, %v1492_v6  ;;  %v1538_v34 = vsel %vm731_vm7, %v3870_v35, %v1537_v36  ;;  %v1560_v44 = vadd.f32 %v1391_v33, %v3545_v27 }
 0x559   :  { %v3198_v41 = vpop.eup %3197  ;;  %v1512_v60 = vadd.f32 %v1511_v39, %v1510_v3  ;;  %v1488_v23 = vrot.slane %v1487_v9, 2  ;;  %v2818_v37 = vmul.f32 -1.442695, %v1559_v30  ;;  %v1734_v52 = vmul.f32 %v3196_v59, %v1692_v0 }
 0x55a   :  { %v3200_v12 = vpop.eup %3199  ;;  %v1633_v56 = vadd.f32 1.0, %v3198_v41  ;;  %v1495_v62 = vrot.slane %v1494_v46, 2  ;;  %v2819_v47 = vmul.f32 -1.442695, %v1560_v44  ;;  %v1735_v1 = vmul.f32 %v3874_v51, %v3842_v57 }
 0x55b   :  { %v3202_v63 = vpop.eup %3201  ;;  %v1634_v31 = vadd.f32 1.0, %v3200_v12  ;;  %v1489_v6 = vadd.f32 %v1488_v23, %v1487_v9  ;;  %3209 = vpow2.f32 %v2818_v37  ;;  %v3913_v35 = vmul.f32 %v3883_v15, %v1696_v49 }
 0x55c   :  { %v1739_v33 = vmul.f32 %v3202_v63, %v3888_v4  ;;  %3211 = vrcp.f32 %v1633_v56  ;;  %v1496_v0 = vadd.f32 %v1495_v62, %v1494_v46  ;;  %v1748_v3 = vrot.slane %v3876_v48, 2 }
 0x55d   :  { %v3204_v50 = vpop.eup %3203  ;;  %3213 = vrcp.f32 %v1634_v31  ;;  %v1490_v7 = vrot.slane %v1489_v6, 1  ;;  %v1754_v57 = vadd.f32 %v1753_v40, %v3868_v38  ;;  %v1761_v51 = vadd.f32 %v1760_v2, %v3852_v17  ;;  %v3930_v17 = vpop.permute.xlu1 %1705 }
 0x55e   :  { %v3206_v61 = vpop.eup %3205  ;;  %v3924_v15 = vsel %vm950_vm11, %v1739_v33, 0.0  ;;  %v1639_v4 = vadd.f32 1.0, %v3204_v50  ;;  %v1497_v30 = vrot.slane %v1496_v0, 1  ;;  %3215 = vpow2.f32 %v2819_v47 }
 0x55f   :  { %v3208_v59 = vpop.eup %3207  ;;  %v3926_v36 = vmul.f32 %v3206_v61, %v1704_v55  ;;  %v1816_v39 = vrot.slane %v3924_v15, 4  ;;  %v1491_v9 = vadd.f32 %v1490_v7, %v1489_v6  ;;  %v1749_v46 = vadd.f32 %v1748_v3, %v3876_v48 }
 0x560   :  { %v1640_v38 = vadd.f32 1.0, %v3208_v59  ;;  %3217 = vrcp.f32 %v1639_v4  ;;  %v1498_v40 = vadd.f32 %v1497_v30, %v1496_v0  ;;  %v1755_v44 = vrot.slane %v1754_v57, 2 }
 0x561   :  { %v1539_v2 = vsel %vm733_vm8, %v1491_v9, %v1538_v34  ;;  %v1750_v41 = vrot.slane %v1749_v46, 1  ;;  %v1762_v23 = vrot.slane %v1761_v51, 2  ;;  %v1766_v37 = vsel %vm950_vm11, %v3849_v42, 0.0  ;;  %v3944_v4 = vpop.permute.xlu1 %1707 }
 0x562   :  { %3219 = vrcp.f32 %v1640_v38  ;;  %v1540_v55 = vsel %vm735_vm9, %v1498_v40, %v1539_v2  ;;  %v1756_v12 = vadd.f32 %v1755_v44, %v1754_v57  ;;  %v1767_v49 = vrot.slane %v1766_v37, 4 }
 0x563   :  { %v1541_v48 = vsel %vm737_vm10, %v1505_v29, %v1540_v55  ;;  %v1751_v56 = vadd.f32 %v1750_v41, %v1749_v46  ;;  %v1763_v62 = vadd.f32 %v1762_v23, %v1761_v51  ;;  %v1773_v47 = vsel %vm950_vm11, %v1733_v58, 0.0 }
 0x564   :  { %v1542_v63 = vsel %vm739_vm12, %v1512_v60, %v1541_v48  ;;  %v1757_v31 = vrot.slane %v1756_v12, 1  ;;  %v1768_v34 = vadd.f32 %v1767_v49, %v1766_v37  ;;  %v1774_v6 = vrot.slane %v1773_v47, 4 }
 0x565   :  { %v3210_v33 = vpop.eup %3209  ;;  %v3940_v0 = vadd.f32 %v1542_v63, %v3508_v45  ;;  %v1764_v42 = vrot.slane %v1763_v62, 1  ;;  %v1780_v3 = vsel %vm950_vm11, %v1734_v52, 0.0  ;;  %v1787_v50 = vsel %vm950_vm11, %v1735_v1, 0.0 }
 0x566   :  { %v3212_v7 = vpop.eup %3211  ;;  %v1637_v29 = vadd.f32 1.0, %v3210_v33  ;;  %v1758_v57 = vadd.f32 %v1757_v31, %v1756_v12  ;;  %v1769_v51 = vrot.slane %v1768_v34, 2  ;;  %v1775_v61 = vadd.f32 %v1774_v6, %v1773_v47  ;;  %v1712_v6 = vpop.permute.xlu1 %1711 }
 0x567   :  { %v3214_v58 = vpop.eup %3213  ;;  %v1737_v60 = vmul.f32 %v3212_v7, %v3896_v54  ;;  %3221 = vtanh.f32 %v3940_v0  ;;  %v1765_v30 = vadd.f32 %v1764_v42, %v1763_v62  ;;  %v1781_v59 = vrot.slane %v1780_v3, 4 }
 0x568   :  { %v3216_v9 = vpop.eup %3215  ;;  %v1738_v46 = vmul.f32 %v3214_v58, %v1700_v28  ;;  %3223 = vrcp.f32 %v1637_v29  ;;  %v1770_v52 = vadd.f32 %v1769_v51, %v1768_v34  ;;  %v1776_v38 = vrot.slane %v1775_v61, 2  ;;  %v1710_v34 = vpop.permute.xlu0 %1709 }
 0x569   :  { %v1801_v1 = vsel %vm950_vm11, %v1737_v60, 0.0  ;;  %v1638_v40 = vadd.f32 1.0, %v3216_v9  ;;  %v1782_v44 = vadd.f32 %v1781_v59, %v1780_v3  ;;  %v1788_v2 = vrot.slane %v1787_v50, 4 }
 0x56a   :  { %v3218_v41 = vpop.eup %3217  ;;  %v1802_v23 = vrot.slane %v1801_v1, 4  ;;  %v1808_v37 = vsel %vm950_vm11, %v1738_v46, 0.0  ;;  %v1771_v55 = vrot.slane %v1770_v52, 1  ;;  %v1777_v54 = vadd.f32 %v1776_v38, %v1775_v61 }
 0x56b   :  { %v1809_v12 = vrot.slane %v1808_v37, 4  ;;  %3225 = vrcp.f32 %v1638_v40  ;;  %v1783_v49 = vrot.slane %v1782_v44, 2  ;;  %v1789_v48 = vadd.f32 %v1788_v2, %v1787_v50 }
 0x56c   :  { %v3220_v62 = vpop.eup %3219  ;;  %v1803_v28 = vadd.f32 %v1802_v23, %v1801_v1  ;;  %v1772_v47 = vadd.f32 %v1771_v55, %v1770_v52  ;;  %v1778_v63 = vrot.slane %v1777_v54, 1  ;;  %v1794_v31 = vsel %vm950_vm11, %v3913_v35, 0.0 }
 0x56d   :  { %v1784_v33 = vadd.f32 %v1783_v49, %v1782_v44  ;;  %v1790_v42 = vrot.slane %v1789_v48, 2  ;;  %v1795_v3 = vrot.slane %v1794_v31, 4  ;;  %v1883_v7 = vsel %vm727_vm5, %v1758_v57, %v1751_v56 }
 0x56e   :  { %v1779_v29 = vadd.f32 %v1778_v63, %v1777_v54  ;;  %v1884_v51 = vsel %vm729_vm6, %v1765_v30, %v1883_v7  ;;  %v1743_v61 = vmul.f32 %v3218_v41, %v1710_v34  ;;  %v1744_v58 = vmul.f32 %v3220_v62, %v1712_v6 }
 0x56f   :  { %v1785_v50 = vrot.slane %v1784_v33, 1  ;;  %v1791_v60 = vadd.f32 %v1790_v42, %v1789_v48  ;;  %v1796_v59 = vadd.f32 %v1795_v3, %v1794_v31  ;;  %v1885_v9 = vsel %vm731_vm7, %v1772_v47, %v1884_v51 }
 0x570   :  { %v1886_v46 = vsel %vm733_vm8, %v1779_v29, %v1885_v9  ;;  %v1804_v35 = vrot.slane %v1803_v28, 2  ;;  %v1810_v52 = vadd.f32 %v1809_v12, %v1808_v37  ;;  %v1817_v38 = vadd.f32 %v1816_v39, %v3924_v15 }
 0x571   :  { %v3222_v1 = vpop.eup %3221  ;;  %v1786_v56 = vadd.f32 %v1785_v50, %v1784_v33  ;;  %v1792_v57 = vrot.slane %v1791_v60, 1  ;;  %v1797_v40 = vrot.slane %v1796_v59, 2  ;;  %v1822_v30 = vsel %vm950_vm11, %v3926_v36, 0.0 }
 0x572   :  { %v3224_v44 = vpop.eup %3223  ;;  %1861 = vrot.lane.b32.xlu1 %v3222_v1, %s3359_s20  ;;  %v1805_v2 = vadd.f32 %v1804_v35, %v1803_v28  ;;  %v1811_v41 = vrot.slane %v1810_v52, 2  ;;  %v1818_v23 = vrot.slane %v1817_v38, 2  ;;  %v1823_v55 = vrot.slane %v1822_v30, 4 }
 0x573   :  { %v1741_v37 = vmul.f32 %v3224_v44, %v3930_v17  ;;  %v1793_v54 = vadd.f32 %v1792_v57, %v1791_v60  ;;  %v1798_v12 = vadd.f32 %v1797_v40, %v1796_v59  ;;  %v1887_v15 = vsel %vm735_vm9, %v1786_v56, %v1886_v46 }
 0x574   :  { %v1806_v39 = vrot.slane %v1805_v2, 1  ;;  %v1812_v49 = vadd.f32 %v1811_v41, %v1810_v52  ;;  %v1819_v48 = vadd.f32 %v1818_v23, %v1817_v38  ;;  %v1824_v62 = vadd.f32 %v1823_v55, %v1822_v30 }
 0x575   :  { %v3226_v47 = vpop.eup %3225  ;;  %v1799_v63 = vrot.slane %v1798_v12, 1  ;;  %v1888_v36 = vsel %vm737_vm10, %v1793_v54, %v1887_v15  ;;  %v1829_v31 = vsel %vm950_vm11, %v1741_v37, 0.0  ;;  %v1843_v28 = vsel %vm950_vm11, %v1743_v61, 0.0 }
 0x576   :  { %v1742_v34 = vmul.f32 %v3226_v47, %v3944_v4  ;;  %v1807_v6 = vadd.f32 %v1806_v39, %v1805_v2  ;;  %v1813_v17 = vrot.slane %v1812_v49, 1  ;;  %v1820_v33 = vrot.slane %v1819_v48, 1 }
 0x577   :  { %v1800_v42 = vadd.f32 %v1799_v63, %v1798_v12  ;;  %v1825_v3 = vrot.slane %v1824_v62, 2  ;;  %v1830_v7 = vrot.slane %v1829_v31, 4  ;;  %v1844_v29 = vrot.slane %v1843_v28, 4 }
 0x578   :  { %v1814_v51 = vadd.f32 %v1813_v17, %v1812_v49  ;;  %v1821_v50 = vadd.f32 %v1820_v33, %v1819_v48  ;;  %v1836_v60 = vsel %vm950_vm11, %v1742_v34, 0.0  ;;  %v1850_v59 = vsel %vm950_vm11, %v1744_v58, 0.0 }
 0x579   :  { %v1889_v9 = vsel %vm739_vm12, %v1800_v42, %v1888_v36  ;;  %v1826_v46 = vadd.f32 %v1825_v3, %v1824_v62  ;;  %v1831_v35 = vadd.f32 %v1830_v7, %v1829_v31  ;;  %v1837_v61 = vrot.slane %v1836_v60, 4 }
 0x57a   :  { %1897 = vrot.lane.b32.xlu0 %v1889_v9, %s3361_s3  ;;  %v1845_v4 = vadd.f32 %v1844_v29, %v1843_v28  ;;  %v1851_v52 = vrot.slane %v1850_v59, 4  ;;  %v1890_v38 = vsel %vm727_vm5, %v1814_v51, %v1807_v6  ;;  %v2804_v17 = vmul.f32 -1.442695, %v3857_v53 }
 0x57b   :  { %v1827_v1 = vrot.slane %v1826_v46, 1  ;;  %v1832_v56 = vrot.slane %v1831_v35, 2  ;;  %v1838_v57 = vadd.f32 %v1837_v61, %v1836_v60  ;;  %v1891_v40 = vsel %vm729_vm6, %v1821_v50, %v1890_v38 }
 0x57c   :  { %v1846_v30 = vrot.slane %v1845_v4, 2  ;;  %v1852_v44 = vadd.f32 %v1851_v52, %v1850_v59  ;;  %3227 = vpow2.f32 %v2804_v17  ;;  %v2805_v42 = vmul.f32 -1.442695, %v3940_v0 }
 0x57d   :  { %v1828_v2 = vadd.f32 %v1827_v1, %v1826_v46  ;;  %v1833_v58 = vadd.f32 %v1832_v56, %v1831_v35  ;;  %v1839_v41 = vrot.slane %v1838_v57, 2 }
 0x57e   :  { %v1847_v23 = vadd.f32 %v1846_v30, %v1845_v4  ;;  %v1853_v55 = vrot.slane %v1852_v44, 2  ;;  %3229 = vpow2.f32 %v2805_v42 }
 0x57f   :  { %v1834_v37 = vrot.slane %v1833_v58, 1  ;;  %v1840_v54 = vadd.f32 %v1839_v41, %v1838_v57  ;;  %v1892_v12 = vsel %vm731_vm7, %v1828_v2, %v1891_v40 }
 0x580   :  { %v1848_v15 = vrot.slane %v1847_v23, 1  ;;  %v1854_v39 = vadd.f32 %v1853_v55, %v1852_v44 }
 0x581   :  { %v1835_v49 = vadd.f32 %v1834_v37, %v1833_v58  ;;  %v1841_v48 = vrot.slane %v1840_v54, 1  ;;  %v3327_v37 = vld [vmem:[%s4246_s1 + $0x8] sm:$0xff] }
 0x582   :  { %v1855_v62 = vrot.slane %v1854_v39, 1  ;;  %v1849_v36 = vadd.f32 %v1848_v15, %v1847_v23  ;;  %v3330_v15 = vld [vmem:[%s4246_s1 + $0x20] sm:$0xff] }
 0x583   :  { %v1842_v47 = vadd.f32 %v1841_v48, %v1840_v54  ;;  %v1893_v63 = vsel %vm733_vm8, %v1835_v49, %v1892_v12  ;;  %v3328_v54 = vld [vmem:[%s4246_s1 + $0x10] sm:$0xff]  ;;  %v3329_v12 = vld [vmem:[%s4246_s1 + $0x18] sm:$0xff] }
 0x584   :  { %v1856_v31 = vadd.f32 %v1855_v62, %v1854_v39  ;;  %v3331_v39 = vld [vmem:[%s4246_s1 + $0x28] sm:$0xff]  ;;  %v3332_v49 = vld [vmem:[%s4246_s1 + $0x30] sm:$0xff]  ;;  %v3333_v48 = vld [vmem:[%s4246_s1 + $0x38] sm:$0xff]  ;;  %s3363_s1 = smov [#allocation2]  }
 0x585   :  { %v1894_v28 = vsel %vm735_vm9, %v1842_v47, %v1893_v63 }
 0x586   :  { %v1895_v34 = vsel %vm737_vm10, %v1849_v36, %v1894_v28  ;;  %v3228_v33 = vpop.eup %3227 }
 0x587   :  { %v1896_v6 = vsel %vm739_vm12, %v1856_v31, %v1895_v34  ;;  %v1569_v3 = vadd.f32 1.0, %v3228_v33 }
 0x588   :  { %1899 = vrot.lane.b32.xlu1 %v1896_v6, %s3361_s3  ;;  %v3230_v7 = vpop.eup %3229 }
 0x589   :  { %3231 = vrcp.f32 %v1569_v3  ;;  %v1570_v50 = vadd.f32 1.0, %v3230_v7 }
 0x58b   :  { %3233 = vrcp.f32 %v1570_v50 }
 0x593   :  { %v3232_v51 = vpop.eup %3231 }
 0x595   :  { %v3234_v35 = vpop.eup %3233 }
 0x5c5   :  { %v1860_v29 = vpop.permute.xlu0 %1859 }
 0x5c6   :  { %v1865_v60 = vmul.f32 %v3232_v51, %v1860_v29 }
 0x5e4   :  { %v1862_v46 = vpop.permute.xlu1 %1861 }
 0x5e5   :  { %v1866_v53 = vmul.f32 %v3234_v35, %v1862_v46 }
 0x5ec   :  { %v1898_v59 = vpop.permute.xlu0 %1897 }
 0x5ed   :  { %v1903_v9 = vadd.f32 %v1898_v59, %v1865_v60 }
 0x5ef   :  { %3235 = vtanh.f32 %v1903_v9 }
 0x5f9   :  { %v3236_v61 = vpop.eup %3235 }
 0x5fa   :  { %v1900_v4 = vpop.permute.xlu1 %1899  ;;  %1909 = vrot.lane.b32.xlu0 %v3236_v61, %s3361_s3 }
 0x5fb   :  { %v1904_v0 = vadd.f32 %v1900_v4, %v1866_v53 }
 0x5fd   :  { %3237 = vtanh.f32 %v1904_v0 }
 0x607   :  { %v3238_v52 = vpop.eup %3237 }
 0x608   :  { %1911 = vrot.lane.b32.xlu1 %v3238_v52, %s3361_s3 }
 0x60c   :  { %1927 = vrot.lane.b32.xlu1 %v1903_v9, %s3361_s3 }
 0x610   :  { %1929 = vrot.lane.b32.xlu1 %v1904_v0, %s3361_s3 }
 0x66c   :  { %v1910_v38 = vpop.permute.xlu0 %1909 }
 0x66d   :  { %v1915_v1 = vmul.f32 %v3232_v51, %v1910_v38 }
 0x66f   :  { %1919 = vrot.lane.b32.xlu0 %v1915_v1, %s3362_s23 }
 0x67a   :  { %v1912_v56 = vpop.permute.xlu1 %1911 }
 0x67b   :  { %v1916_v57 = vmul.f32 %v3234_v35, %v1912_v56 }
 0x67d   :  { %1921 = vrot.lane.b32.xlu0 %v1916_v57, %s3362_s23 }
 0x67e   :  { %v1928_v40 = vpop.permute.xlu1 %1927 }
 0x682   :  { %v1930_v2 = vpop.permute.xlu1 %1929 }
 0x6e1   :  { %v1920_v30 = vpop.permute.xlu0 %1919 }
 0x6e2   :  { %v1933_v44 = vsel %vm444_vm3, %v1920_v30, %v1928_v40 }
 0x6e3   :  { %v1935_v58 = vmul.f32 %v3435_v13, %v1933_v44 }
 0x6ef   :  { %v1922_v41 = vpop.permute.xlu0 %1921 }
 0x6f0   :  { %v1934_v23 = vsel %vm444_vm3, %v1922_v41, %v1930_v2 }
 0x6f1   :  { %v3055_v55 = vpack.c.bf16 %v1934_v23, %v1935_v58 }
 0x6f3   :  { %3056 = vmatprep.subr.bf16.mxu1 %v3055_v55 }
 0x6f4   :  { %3058 = vmatpush3.bf16.msra.mxu1 %v3055_v55 }
 0x6f7   :  { %3004 = vmatmul.mubr.msk.f32.vlgmr.msra.gmra.mrb[18].mxu1 %vm314_vm0, %v3327_v37 }
 0x6f8   :  { %3006 = vmatprep.mubr.msk.f32.mxu1 %vm314_vm0, %v3328_v54 }
 0x6fb   :  { %3007 = vmatmul.mubr.msk.f32.gmra.mrb[20].mxu1 %vm314_vm0, %v3329_v12 }
 0x6fc   :  { %3009 = vmatprep.mubr.msk.f32.mxu1 %vm314_vm0, %v3330_v15 }
 0x6ff   :  { %3010 = vmatmul.mubr.msk.f32.gmra.mrb[22].mxu1 %vm314_vm0, %v3331_v39 }
 0x700   :  { %3012 = vmatprep.mubr.msk.f32.mxu1 %vm314_vm0, %v3332_v49 }
 0x703   :  { %3013 = vmatmul.mubr.msk.f32.gmra.mrb[24].mxu1 %vm314_vm0, %v3333_v48 }
 0x7ca   :  { %v3005_v62 = vpop.f32.mrb[18].mxu1 }
 0x7cb   :  { %v2468_v47 = vcombine.high %v3005_v62, %v3005_v62  ;;  %2479 = vrot.lane.b32.xlu0 %v3005_v62, %s3359_s20  ;;  %v2003_v63 = vpop.f32.mrb[19].mxu1 }
 0x7cc   :  { %3023 = vmatprep.mubr.msk.f32.mxu0 %vm444_vm3, %v2003_v63  ;;  %v2467_v31 = vcombine.high %v2003_v63, %v2003_v63 }
 0x7cd   :  { %2481 = vrot.lane.b32.xlu1 %v2468_v47, %s3359_s20  ;;  %3024 = vmatmul.mubr.msk.f32.vlgmr.msra.gmra.mrb[16].mxu0 %vm444_vm3, %v3005_v62 }
 0x7ce   :  { %v3008_v36 = vpop.f32.mrb[20].mxu1 }
 0x7cf   :  { %2475 = vrot.lane.b32.xlu0 %v2003_v63, %s3359_s20  ;;  %v2013_v28 = vpop.f32.mrb[21].mxu1  ;;  %v2470_v29 = vcombine.high %v3008_v36, %v3008_v36 }
 0x7d0   :  { %3026 = vmatprep.mubr.msk.f32.mxu0 %vm444_vm3, %v2013_v28  ;;  %v2469_v3 = vcombine.high %v2013_v28, %v2013_v28 }
 0x7d1   :  { %2477 = vrot.lane.b32.xlu1 %v2467_v31, %s3359_s20  ;;  %3027 = vmatmul.mubr.msk.f32.gmra.mrb[18].mxu0 %vm444_vm3, %v3008_v36 }
 0x7d2   :  { %v3011_v34 = vpop.f32.mrb[22].mxu1 }
 0x7d3   :  { %2487 = vrot.lane.b32.xlu0 %v3008_v36, %s3359_s20  ;;  %v2023_v6 = vpop.f32.mrb[23].mxu1  ;;  %v2472_v33 = vcombine.high %v3011_v34, %v3011_v34 }
 0x7d4   :  { %3029 = vmatprep.mubr.msk.f32.mxu0 %vm444_vm3, %v2023_v6  ;;  %v2471_v7 = vcombine.high %v2023_v6, %v2023_v6 }
 0x7d5   :  { %2495 = vrot.lane.b32.xlu1 %v3011_v34, %s3359_s20  ;;  %3030 = vmatmul.mubr.msk.f32.gmra.mrb[20].mxu0 %vm444_vm3, %v3011_v34 }
 0x7d6   :  { %v3014_v17 = vpop.f32.mrb[24].mxu1 }
 0x7d7   :  { %2483 = vrot.lane.b32.xlu0 %v2013_v28, %s3359_s20  ;;  %v2033_v42 = vpop.f32.mrb[25].mxu1  ;;  %v2474_v50 = vcombine.high %v3014_v17, %v3014_v17 }
 0x7d8   :  { %3032 = vmatprep.mubr.msk.f32.mxu0 %vm444_vm3, %v2033_v42  ;;  %v2473_v51 = vcombine.high %v2033_v42, %v2033_v42 }
 0x7d9   :  { %2497 = vrot.lane.b32.xlu1 %v2472_v33, %s3359_s20  ;;  %3033 = vmatmul.mubr.msk.f32.gmra.mrb[22].mxu0 %vm444_vm3, %v3014_v17 }
 0x7db   :  { %2485 = vrot.lane.b32.xlu0 %v2469_v3, %s3359_s20 }
 0x7dd   :  { %2493 = vrot.lane.b32.xlu1 %v2471_v7, %s3359_s20 }
 0x7df   :  { %2491 = vrot.lane.b32.xlu0 %v2023_v6, %s3359_s20 }
 0x7e1   :  { %2499 = vrot.lane.b32.xlu1 %v2033_v42, %s3359_s20 }
 0x7e3   :  { %2489 = vrot.lane.b32.xlu0 %v2470_v29, %s3359_s20 }
 0x7e5   :  { %2501 = vrot.lane.b32.xlu1 %v2473_v51, %s3359_s20 }
 0x7e7   :  { %2503 = vrot.lane.b32.xlu0 %v3014_v17, %s3359_s20 }
 0x7e9   :  { %2505 = vrot.lane.b32.xlu1 %v2474_v50, %s3359_s20 }
 0x8a0   :  { %v3025_v60 = vpop.f32.mrb[16].mxu0 }
 0x8a1   :  { %v2180_v59 = vcombine.high %v3025_v60, %v3025_v60  ;;  %v2209_v9 = vsel %vm598_vm4, %v3025_v60, 0.0  ;;  %v2343_v46 = vadd.f32 %v3025_v60, %v3517_v8  ;;  %v2132_v35 = vpop.f32.mrb[17].mxu0 }
 0x8a2   :  { %v2210_v61 = vrot.slane %v2209_v9, 4  ;;  %v2179_v53 = vcombine.high %v2132_v35, %v2132_v35  ;;  %v2195_v4 = vsel %vm598_vm4, %v2132_v35, 0.0  ;;  %v2341_v0 = vadd.f32 %v2132_v35, %v3521_v11 }
 0x8a3   :  { %v2216_v52 = vsel %vm598_vm4, %v2180_v59, 0.0  ;;  %v2344_v38 = vadd.f32 %v2180_v59, %v3519_v10  ;;  %v2842_v1 = vmul.f32 -1.442695, %v2343_v46  ;;  %v2196_v56 = vrot.slane %v2195_v4, 4 }
 0x8a4   :  { %v2211_v57 = vadd.f32 %v2210_v61, %v2209_v9  ;;  %v2217_v40 = vrot.slane %v2216_v52, 4  ;;  %v2202_v30 = vsel %vm598_vm4, %v2179_v53, 0.0  ;;  %v2342_v44 = vadd.f32 %v2179_v53, %v3523_v14  ;;  %v3028_v8 = vpop.f32.mrb[18].mxu0 }
 0x8a5   :  { %3239 = vpow2.f32 %v2842_v1  ;;  %v2843_v2 = vmul.f32 -1.442695, %v2344_v38  ;;  %v2197_v58 = vadd.f32 %v2196_v56, %v2195_v4  ;;  %v2203_v41 = vrot.slane %v2202_v30, 4  ;;  %v4051_v23 = vpop.f32.mrb[19].mxu0  ;;  %v2480_v56 = vpop.permute.xlu0 %2479 }
 0x8a6   :  { %v2212_v11 = vrot.slane %v2211_v57, 2  ;;  %v2218_v55 = vadd.f32 %v2217_v40, %v2216_v52  ;;  %v2840_v37 = vmul.f32 -1.442695, %v2341_v0  ;;  %v2841_v54 = vmul.f32 -1.442695, %v2342_v44 }
 0x8a7   :  { %3241 = vpow2.f32 %v2843_v2  ;;  %v2198_v10 = vrot.slane %v2197_v58, 2  ;;  %v2204_v12 = vadd.f32 %v2203_v41, %v2202_v30  ;;  %v2182_v15 = vcombine.high %v3028_v8, %v3028_v8 }
 0x8a8   :  { %v2213_v39 = vadd.f32 %v2212_v11, %v2211_v57  ;;  %v2219_v49 = vrot.slane %v2218_v55, 2  ;;  %3243 = vpow2.f32 %v2840_v37  ;;  %v2237_v14 = vsel %vm598_vm4, %v3028_v8, 0.0  ;;  %v4054_v48 = vpop.f32.mrb[20].mxu0 }
 0x8a9   :  { %v2199_v62 = vadd.f32 %v2198_v10, %v2197_v58  ;;  %v2205_v47 = vrot.slane %v2204_v12, 2  ;;  %3245 = vpow2.f32 %v2841_v54  ;;  %v2238_v63 = vrot.slane %v2237_v14, 4  ;;  %v4056_v36 = vpop.f32.mrb[21].mxu0 }
 0x8aa   :  { %v2214_v31 = vrot.slane %v2213_v39, 1  ;;  %v2220_v28 = vadd.f32 %v2219_v49, %v2218_v55  ;;  %v2244_v34 = vsel %vm598_vm4, %v2182_v15, 0.0  ;;  %v2347_v6 = vadd.f32 %v3028_v8, %v3525_v5 }
 0x8ab   :  { %v2200_v17 = vrot.slane %v2199_v62, 1  ;;  %v2206_v33 = vadd.f32 %v2205_v47, %v2204_v12  ;;  %v2239_v42 = vadd.f32 %v2238_v63, %v2237_v14  ;;  %v2245_v3 = vrot.slane %v2244_v34, 4 }
 0x8ac   :  { %v2215_v7 = vadd.f32 %v2214_v31, %v2213_v39  ;;  %v2221_v29 = vrot.slane %v2220_v28, 1  ;;  %v2348_v51 = vadd.f32 %v2182_v15, %v3527_v16  ;;  %v2846_v50 = vmul.f32 -1.442695, %v2347_v6  ;;  %v4061_v60 = vpop.f32.mrb[22].mxu0 }
 0x8ad   :  { %v2201_v59 = vadd.f32 %v2200_v17, %v2199_v62  ;;  %v2207_v9 = vrot.slane %v2206_v33, 1  ;;  %v2240_v46 = vrot.slane %v2239_v42, 2  ;;  %v2246_v35 = vadd.f32 %v2245_v3, %v2244_v34  ;;  %v4063_v61 = vpop.f32.mrb[23].mxu0  ;;  %v2476_v34 = vpop.permute.xlu0 %2475 }
 0x8ae   :  { %v2222_v53 = vadd.f32 %v2221_v29, %v2220_v28  ;;  %3247 = vpow2.f32 %v2846_v50  ;;  %v2847_v5 = vmul.f32 -1.442695, %v2348_v51  ;;  %v2181_v4 = vcombine.high %v4051_v23, %v4051_v23 }
 0x8af   :  { %v3240_v0 = vpop.eup %3239  ;;  %v2208_v52 = vadd.f32 %v2207_v9, %v2206_v33  ;;  %v2241_v38 = vadd.f32 %v2240_v46, %v2239_v42  ;;  %v2247_v1 = vrot.slane %v2246_v35, 2  ;;  %v2223_v16 = vsel %vm598_vm4, %v4051_v23, 0.0 }
 0x8b0   :  { %v2421_v57 = vadd.f32 1.0, %v3240_v0  ;;  %3249 = vpow2.f32 %v2847_v5  ;;  %v2224_v40 = vrot.slane %v2223_v16, 4  ;;  %v2230_v30 = vsel %vm598_vm4, %v2181_v4, 0.0 }
 0x8b1   :  { %v3242_v44 = vpop.eup %3241  ;;  %v2323_v8 = vsel %vm727_vm5, %v2208_v52, %v2201_v59  ;;  %v2242_v2 = vrot.slane %v2241_v38, 1  ;;  %v2248_v58 = vadd.f32 %v2247_v1, %v2246_v35  ;;  %v2231_v41 = vrot.slane %v2230_v30, 4  ;;  %v4084_v1 = vpop.permute.xlu0 %2487 }
 0x8b2   :  { %v3244_v11 = vpop.eup %3243  ;;  %v2422_v55 = vadd.f32 1.0, %v3242_v44  ;;  %3251 = vrcp.f32 %v2421_v57  ;;  %v2324_v37 = vsel %vm729_vm6, %v2215_v7, %v2323_v8  ;;  %v2225_v54 = vadd.f32 %v2224_v40, %v2223_v16 }
 0x8b3   :  { %v3246_v10 = vpop.eup %3245  ;;  %v2419_v12 = vadd.f32 1.0, %v3244_v11  ;;  %v2243_v15 = vadd.f32 %v2242_v2, %v2241_v38  ;;  %v2249_v39 = vrot.slane %v2248_v58, 1  ;;  %v2232_v49 = vadd.f32 %v2231_v41, %v2230_v30 }
 0x8b4   :  { %3253 = vrcp.f32 %v2422_v55  ;;  %v2420_v14 = vadd.f32 1.0, %v3246_v10  ;;  %v2226_v62 = vrot.slane %v2225_v54, 2  ;;  %v2325_v47 = vsel %vm731_vm7, %v2222_v53, %v2324_v37  ;;  %v2482_v53 = vpop.permute.xlu1 %2481 }
 0x8b5   :  { %3255 = vrcp.f32 %v2419_v12  ;;  %v2250_v63 = vadd.f32 %v2249_v39, %v2248_v58  ;;  %v2233_v31 = vrot.slane %v2232_v49, 2  ;;  %v2345_v28 = vadd.f32 %v4051_v23, %v3529_v18 }
 0x8b6   :  { %3257 = vrcp.f32 %v2420_v14  ;;  %v2227_v6 = vadd.f32 %v2226_v62, %v2225_v54  ;;  %v2346_v17 = vadd.f32 %v2181_v4, %v3531_v19  ;;  %v2184_v33 = vcombine.high %v4054_v48, %v4054_v48 }
 0x8b7   :  { %v2234_v42 = vadd.f32 %v2233_v31, %v2232_v49  ;;  %v2844_v3 = vmul.f32 -1.442695, %v2345_v28  ;;  %v2265_v7 = vsel %vm598_vm4, %v4054_v48, 0.0  ;;  %v2351_v29 = vadd.f32 %v4054_v48, %v3533_v20 }
 0x8b8   :  { %v3248_v51 = vpop.eup %3247  ;;  %v2228_v50 = vrot.slane %v2227_v6, 1  ;;  %v2845_v59 = vmul.f32 -1.442695, %v2346_v17  ;;  %v2266_v18 = vrot.slane %v2265_v7, 4  ;;  %v2272_v23 = vsel %vm598_vm4, %v2184_v33, 0.0  ;;  %v2478_v39 = vpop.permute.xlu1 %2477 }
 0x8b9   :  { %v2425_v9 = vadd.f32 1.0, %v3248_v51  ;;  %v2235_v46 = vrot.slane %v2234_v42, 1  ;;  %3259 = vpow2.f32 %v2844_v3  ;;  %v2273_v19 = vrot.slane %v2272_v23, 4 }
 0x8ba   :  { %v3250_v35 = vpop.eup %3249  ;;  %v2229_v5 = vadd.f32 %v2228_v50, %v2227_v6  ;;  %3261 = vpow2.f32 %v2845_v59  ;;  %v2267_v4 = vadd.f32 %v2266_v18, %v2265_v7  ;;  %v2352_v0 = vadd.f32 %v2184_v33, %v3535_v21  ;;  %v4103_v6 = vpop.permute.xlu0 %2483 }
 0x8bb   :  { %v2426_v52 = vadd.f32 1.0, %v3250_v35  ;;  %3263 = vrcp.f32 %v2425_v9  ;;  %v2236_v20 = vadd.f32 %v2235_v46, %v2234_v42  ;;  %v2274_v48 = vadd.f32 %v2273_v19, %v2272_v23 }
 0x8bc   :  { %v3252_v38 = vpop.eup %3251  ;;  %v2326_v16 = vsel %vm733_vm8, %v2229_v5, %v2325_v47  ;;  %v2268_v57 = vrot.slane %v2267_v4, 2  ;;  %v2850_v40 = vmul.f32 -1.442695, %v2351_v29  ;;  %v2851_v30 = vmul.f32 -1.442695, %v2352_v0 }
 0x8bd   :  { %v2525_v44 = vmul.f32 %v3252_v38, %v2480_v56  ;;  %3265 = vrcp.f32 %v2426_v52  ;;  %v2327_v8 = vsel %vm735_vm9, %v2236_v20, %v2326_v16  ;;  %v2275_v2 = vrot.slane %v2274_v48, 2 }
 0x8be   :  { %v3254_v58 = vpop.eup %3253  ;;  %v2328_v21 = vsel %vm737_vm10, %v2243_v15, %v2327_v8  ;;  %v2269_v41 = vadd.f32 %v2268_v57, %v2267_v4  ;;  %3267 = vpow2.f32 %v2850_v40  ;;  %v2183_v11 = vcombine.high %v4056_v36, %v4056_v36  ;;  %v2486_v16 = vpop.permute.xlu0 %2485 }
 0x8bf   :  { %v3256_v55 = vpop.eup %3255  ;;  %v4091_v37 = vmul.f32 %v3254_v58, %v2482_v53  ;;  %v4094_v54 = vsel %vm950_vm11, %v2525_v44, 0.0  ;;  %v2329_v56 = vsel %vm739_vm12, %v2250_v63, %v2328_v21  ;;  %v2276_v10 = vadd.f32 %v2275_v2, %v2274_v48  ;;  %v4130_v40 = vpop.permute.xlu1 %2495 }
 0x8c0   :  { %v3258_v12 = vpop.eup %3257  ;;  %v2554_v49 = vrot.slane %v4094_v54, 4  ;;  %v2523_v14 = vmul.f32 %v3256_v55, %v2476_v34  ;;  %v4099_v15 = vadd.f32 %v2329_v56, %v3505_v43  ;;  %v2270_v62 = vrot.slane %v2269_v41, 1 }
 0x8c1   :  { %v2524_v47 = vmul.f32 %v3258_v12, %v2478_v39  ;;  %v2277_v31 = vrot.slane %v2276_v10, 1  ;;  %3269 = vpow2.f32 %v2851_v30  ;;  %v2251_v28 = vsel %vm598_vm4, %v4056_v36, 0.0 }
 0x8c2   :  { %v2539_v63 = vsel %vm950_vm11, %v2523_v14, 0.0  ;;  %3271 = vtanh.f32 %v4099_v15  ;;  %v4107_v17 = vadd.f32 %v2270_v62, %v2269_v41  ;;  %v2252_v33 = vrot.slane %v2251_v28, 4 }
 0x8c3   :  { %v3260_v34 = vpop.eup %3259  ;;  %v2540_v42 = vrot.slane %v2539_v63, 4  ;;  %v4110_v43 = vsel %vm950_vm11, %v2524_v47, 0.0  ;;  %v4112_v3 = vadd.f32 %v2277_v31, %v2276_v10  ;;  %v2258_v7 = vsel %vm598_vm4, %v2183_v11, 0.0 }
 0x8c4   :  { %v3262_v29 = vpop.eup %3261  ;;  %v2547_v51 = vrot.slane %v4110_v43, 4  ;;  %v2423_v50 = vadd.f32 1.0, %v3260_v34  ;;  %v2253_v59 = vadd.f32 %v2252_v33, %v2251_v28  ;;  %v2259_v18 = vrot.slane %v2258_v7, 4  ;;  %v2498_v33 = vpop.permute.xlu1 %2497 }
 0x8c5   :  { %v4116_v23 = vpop.eup %3263  ;;  %v4118_v9 = vadd.f32 %v2540_v42, %v2539_v63  ;;  %v2424_v46 = vadd.f32 1.0, %v3262_v29  ;;  %v2349_v19 = vadd.f32 %v4056_v36, %v3537_v22  ;;  %v2350_v35 = vadd.f32 %v2183_v11, %v3539_v24 }
 0x8c6   :  { %3273 = vrcp.f32 %v2423_v50  ;;  %v2254_v53 = vrot.slane %v2253_v59, 2  ;;  %v2260_v5 = vadd.f32 %v2259_v18, %v2258_v7  ;;  %v2186_v4 = vcombine.high %v4061_v60, %v4061_v60 }
 0x8c7   :  { %v4125_v0 = vpop.eup %3265  ;;  %3275 = vrcp.f32 %v2424_v46  ;;  %v2848_v52 = vmul.f32 -1.442695, %v2349_v19  ;;  %v2849_v20 = vmul.f32 -1.442695, %v2350_v35  ;;  %v2293_v48 = vsel %vm598_vm4, %v4061_v60, 0.0 }
 0x8c8   :  { %v3268_v38 = vpop.eup %3267  ;;  %v2255_v57 = vadd.f32 %v2254_v53, %v2253_v59  ;;  %v2261_v22 = vrot.slane %v2260_v5, 2  ;;  %v2294_v36 = vrot.slane %v2293_v48, 4  ;;  %v2300_v24 = vsel %vm598_vm4, %v2186_v4, 0.0 }
 0x8c9   :  { %v2429_v30 = vadd.f32 1.0, %v3268_v38  ;;  %3277 = vpow2.f32 %v2848_v52  ;;  %v2301_v44 = vrot.slane %v2300_v24, 4  ;;  %v2355_v8 = vadd.f32 %v4061_v60, %v3541_v25  ;;  %v4138_v60 = vpop.permute.xlu0 %2491 }
 0x8ca   :  { %v2256_v2 = vrot.slane %v2255_v57, 1  ;;  %v2262_v58 = vadd.f32 %v2261_v22, %v2260_v5  ;;  %3279 = vpow2.f32 %v2849_v20  ;;  %v2295_v21 = vadd.f32 %v2294_v36, %v2293_v48 }
 0x8cb   :  { %v3270_v41 = vpop.eup %3269  ;;  %3281 = vrcp.f32 %v2429_v30  ;;  %v2302_v11 = vadd.f32 %v2301_v44, %v2300_v24  ;;  %v2356_v55 = vadd.f32 %v2186_v4, %v3549_v32  ;;  %v2854_v56 = vmul.f32 -1.442695, %v2355_v8 }
 0x8cc   :  { %v3272_v10 = vpop.eup %3271  ;;  %v2430_v12 = vadd.f32 1.0, %v3270_v41  ;;  %v2257_v39 = vadd.f32 %v2256_v2, %v2255_v57  ;;  %v2263_v14 = vrot.slane %v2262_v58, 1  ;;  %v2296_v62 = vrot.slane %v2295_v21, 2 }
 0x8cd   :  { %v2303_v47 = vrot.slane %v2302_v11, 2  ;;  %3283 = vpow2.f32 %v2854_v56  ;;  %v2855_v31 = vmul.f32 -1.442695, %v2356_v55  ;;  %v2185_v25 = vcombine.high %v4063_v61, %v4063_v61  ;;  %2653 = vrot.lane.b32.xlu0 %v3272_v10, %s3359_s20  ;;  %v2490_v30 = vpop.permute.xlu0 %2489 }
 0x8ce   :  { %3285 = vrcp.f32 %v2430_v12  ;;  %v2264_v28 = vadd.f32 %v2263_v14, %v2262_v58  ;;  %v2297_v63 = vadd.f32 %v2296_v62, %v2295_v21  ;;  %v2279_v32 = vsel %vm598_vm4, %v4063_v61, 0.0  ;;  %v2494_v58 = vpop.permute.xlu1 %2493 }
 0x8cf   :  { %v2304_v34 = vadd.f32 %v2303_v47, %v2302_v11  ;;  %3287 = vpow2.f32 %v2855_v31  ;;  %v2280_v42 = vrot.slane %v2279_v32, 4  ;;  %v2286_v7 = vsel %vm598_vm4, %v2185_v25, 0.0 }
 0x8d0   :  { %v3274_v29 = vpop.eup %3273  ;;  %v2330_v50 = vsel %vm727_vm5, %v2264_v28, %v2257_v39  ;;  %v2298_v59 = vrot.slane %v2297_v63, 1  ;;  %v2287_v18 = vrot.slane %v2286_v7, 4  ;;  %v2353_v46 = vadd.f32 %v4063_v61, %v3543_v26 }
 0x8d1   :  { %v3276_v19 = vpop.eup %3275  ;;  %v2527_v35 = vmul.f32 %v3274_v29, %v4103_v6  ;;  %v2331_v53 = vsel %vm729_vm6, %v4107_v17, %v2330_v50  ;;  %v2305_v5 = vrot.slane %v2304_v34, 1  ;;  %v2281_v4 = vadd.f32 %v2280_v42, %v2279_v32 }
 0x8d2   :  { %v2299_v52 = vadd.f32 %v2298_v59, %v2297_v63  ;;  %v2288_v20 = vadd.f32 %v2287_v18, %v2286_v7  ;;  %v2332_v48 = vsel %vm731_vm7, %v4112_v3, %v2331_v53  ;;  %v2354_v38 = vadd.f32 %v2185_v25, %v3545_v27 }
 0x8d3   :  { %v3278_v57 = vpop.eup %3277  ;;  %v2306_v22 = vadd.f32 %v2305_v5, %v2304_v34  ;;  %v2282_v36 = vrot.slane %v2281_v4, 2  ;;  %v2852_v24 = vmul.f32 -1.442695, %v2353_v46  ;;  %v2528_v26 = vmul.f32 %v3276_v19, %v2486_v16 }
 0x8d4   :  { %v3280_v61 = vpop.eup %3279  ;;  %v2427_v6 = vadd.f32 1.0, %v3278_v57  ;;  %v2289_v44 = vrot.slane %v2288_v20, 2  ;;  %v2853_v8 = vmul.f32 -1.442695, %v2354_v38  ;;  %v2529_v17 = vmul.f32 %v4116_v23, %v4084_v1 }
 0x8d5   :  { %v3282_v2 = vpop.eup %3281  ;;  %v2428_v21 = vadd.f32 1.0, %v3280_v61  ;;  %v2283_v41 = vadd.f32 %v2282_v36, %v2281_v4  ;;  %3289 = vpow2.f32 %v2852_v24  ;;  %v4155_v27 = vmul.f32 %v4125_v0, %v2490_v30 }
 0x8d6   :  { %v2533_v3 = vmul.f32 %v3282_v2, %v4130_v40  ;;  %3291 = vrcp.f32 %v2427_v6  ;;  %v2290_v16 = vadd.f32 %v2289_v44, %v2288_v20  ;;  %v2542_v11 = vrot.slane %v4118_v9, 2 }
 0x8d7   :  { %v3284_v55 = vpop.eup %3283  ;;  %3293 = vrcp.f32 %v2428_v21  ;;  %v2284_v56 = vrot.slane %v2283_v41, 1  ;;  %v2548_v1 = vadd.f32 %v2547_v51, %v4110_v43  ;;  %v2555_v23 = vadd.f32 %v2554_v49, %v4094_v54  ;;  %v4172_v54 = vpop.permute.xlu1 %2499 }
 0x8d8   :  { %v3286_v10 = vpop.eup %3285  ;;  %v4166_v0 = vsel %vm950_vm11, %v2533_v3, 0.0  ;;  %v2433_v40 = vadd.f32 1.0, %v3284_v55  ;;  %v2291_v12 = vrot.slane %v2290_v16, 1  ;;  %3295 = vpow2.f32 %v2853_v8 }
 0x8d9   :  { %v3288_v39 = vpop.eup %3287  ;;  %v4168_v14 = vmul.f32 %v3286_v10, %v2498_v33  ;;  %v2610_v62 = vrot.slane %v4166_v0, 4  ;;  %v2285_v47 = vadd.f32 %v2284_v56, %v2283_v41  ;;  %v2543_v31 = vadd.f32 %v2542_v11, %v4118_v9 }
 0x8da   :  { %v2434_v43 = vadd.f32 1.0, %v3288_v39  ;;  %3297 = vrcp.f32 %v2433_v40  ;;  %v2292_v51 = vadd.f32 %v2291_v12, %v2290_v16  ;;  %v2549_v25 = vrot.slane %v2548_v1, 2  ;;  %v2504_v39 = vpop.permute.xlu0 %2503 }
 0x8db   :  { %v2333_v49 = vsel %vm733_vm8, %v2285_v47, %v2332_v48  ;;  %v2544_v28 = vrot.slane %v2543_v31, 1  ;;  %v2556_v63 = vrot.slane %v2555_v23, 2  ;;  %v2560_v32 = vsel %vm950_vm11, %v4091_v37, 0.0  ;;  %v4186_v24 = vpop.permute.xlu1 %2501 }
 0x8dc   :  { %3299 = vrcp.f32 %v2434_v43  ;;  %v2334_v33 = vsel %vm735_vm9, %v2292_v51, %v2333_v49  ;;  %v2550_v34 = vadd.f32 %v2549_v25, %v2548_v1  ;;  %v2561_v42 = vrot.slane %v2560_v32, 4 }
 0x8dd   :  { %v2335_v9 = vsel %vm737_vm10, %v2299_v52, %v2334_v33  ;;  %v2545_v7 = vadd.f32 %v2544_v28, %v2543_v31  ;;  %v2557_v29 = vadd.f32 %v2556_v63, %v2555_v23  ;;  %v2567_v50 = vsel %vm950_vm11, %v2527_v35, 0.0 }
 0x8de   :  { %v2336_v59 = vsel %vm739_vm12, %v2306_v22, %v2335_v9  ;;  %v2551_v18 = vrot.slane %v2550_v34, 1  ;;  %v2562_v46 = vadd.f32 %v2561_v42, %v2560_v32  ;;  %v2568_v19 = vrot.slane %v2567_v50, 4 }
 0x8df   :  { %v3290_v53 = vpop.eup %3289  ;;  %v4182_v5 = vadd.f32 %v2336_v59, %v3508_v45  ;;  %v2558_v37 = vrot.slane %v2557_v29, 1  ;;  %v2574_v4 = vsel %vm950_vm11, %v2528_v26, 0.0  ;;  %v2581_v20 = vsel %vm950_vm11, %v2529_v17, 0.0  ;;  %v2506_v47 = vpop.permute.xlu1 %2505 }
 0x8e0   :  { %v3292_v48 = vpop.eup %3291  ;;  %v2431_v52 = vadd.f32 1.0, %v3290_v53  ;;  %v2552_v38 = vadd.f32 %v2551_v18, %v2550_v34  ;;  %v2563_v57 = vrot.slane %v2562_v46, 2  ;;  %v2569_v36 = vadd.f32 %v2568_v19, %v2567_v50 }
 0x8e1   :  { %v3294_v35 = vpop.eup %3293  ;;  %v2531_v22 = vmul.f32 %v3292_v48, %v4138_v60  ;;  %3301 = vtanh.f32 %v4182_v5  ;;  %v2559_v61 = vadd.f32 %v2558_v37, %v2557_v29  ;;  %v2575_v45 = vrot.slane %v2574_v4, 4 }
 0x8e2   :  { %v3296_v30 = vpop.eup %3295  ;;  %v2532_v6 = vmul.f32 %v3294_v35, %v2494_v58  ;;  %3303 = vrcp.f32 %v2431_v52  ;;  %v2564_v26 = vadd.f32 %v2563_v57, %v2562_v46  ;;  %v2570_v44 = vrot.slane %v2569_v36, 2 }
 0x8e3   :  { %v2595_v8 = vsel %vm950_vm11, %v2531_v22, 0.0  ;;  %v2432_v17 = vadd.f32 1.0, %v3296_v30  ;;  %v2576_v2 = vadd.f32 %v2575_v45, %v2574_v4  ;;  %v2582_v21 = vrot.slane %v2581_v20, 4 }
 0x8e4   :  { %v3298_v41 = vpop.eup %3297  ;;  %v2596_v3 = vrot.slane %v2595_v8, 4  ;;  %v2602_v16 = vsel %vm950_vm11, %v2532_v6, 0.0  ;;  %v2565_v11 = vrot.slane %v2564_v26, 1  ;;  %v2571_v60 = vadd.f32 %v2570_v44, %v2569_v36 }
 0x8e5   :  { %v2603_v55 = vrot.slane %v2602_v16, 4  ;;  %3305 = vrcp.f32 %v2432_v17  ;;  %v2577_v56 = vrot.slane %v2576_v2, 2  ;;  %v2583_v1 = vadd.f32 %v2582_v21, %v2581_v20 }
 0x8e6   :  { %v3300_v23 = vpop.eup %3299  ;;  %v2597_v58 = vadd.f32 %v2596_v3, %v2595_v8  ;;  %v2566_v10 = vadd.f32 %v2565_v11, %v2564_v26  ;;  %v2572_v40 = vrot.slane %v2571_v60, 1  ;;  %v2588_v12 = vsel %vm950_vm11, %v4155_v27, 0.0 }
 0x8e7   :  { %v2578_v31 = vadd.f32 %v2577_v56, %v2576_v2  ;;  %v2584_v43 = vrot.slane %v2583_v1, 2  ;;  %v2589_v51 = vrot.slane %v2588_v12, 4  ;;  %v2677_v25 = vsel %vm727_vm5, %v2552_v38, %v2545_v7 }
 0x8e8   :  { %v2573_v49 = vadd.f32 %v2572_v40, %v2571_v60  ;;  %v2678_v28 = vsel %vm729_vm6, %v2559_v61, %v2677_v25  ;;  %v2537_v63 = vmul.f32 %v3298_v41, %v2504_v39  ;;  %v2538_v32 = vmul.f32 %v3300_v23, %v2506_v47 }
 0x8e9   :  { %v2579_v33 = vrot.slane %v2578_v31, 1  ;;  %v2585_v34 = vadd.f32 %v2584_v43, %v2583_v1  ;;  %v2590_v42 = vadd.f32 %v2589_v51, %v2588_v12  ;;  %v2679_v9 = vsel %vm731_vm7, %v2566_v10, %v2678_v28 }
 0x8ea   :  { %v2680_v29 = vsel %vm733_vm8, %v2573_v49, %v2679_v9  ;;  %v2598_v27 = vrot.slane %v2597_v58, 2  ;;  %v2604_v50 = vadd.f32 %v2603_v55, %v2602_v16  ;;  %v2611_v59 = vadd.f32 %v2610_v62, %v4166_v0 }
 0x8eb   :  { %v3302_v18 = vpop.eup %3301  ;;  %v2580_v7 = vadd.f32 %v2579_v33, %v2578_v31  ;;  %v2586_v46 = vrot.slane %v2585_v34, 1  ;;  %v2591_v19 = vrot.slane %v2590_v42, 2  ;;  %v2616_v53 = vsel %vm950_vm11, %v4168_v14, 0.0 }
 0x8ec   :  { %v3304_v37 = vpop.eup %3303  ;;  %2655 = vrot.lane.b32.xlu1 %v3302_v18, %s3359_s20  ;;  %v2599_v4 = vadd.f32 %v2598_v27, %v2597_v58  ;;  %v2605_v20 = vrot.slane %v2604_v50, 2  ;;  %v2612_v48 = vrot.slane %v2611_v59, 2  ;;  %v2617_v52 = vrot.slane %v2616_v53, 4  ;;  %s2739_s20 = sshll.u32 %s3363_s1, 4  ;;  %s2740_s20 = int_to_ptr.vmem [resolvable:$true] %s2739_s20 }
 0x8ed   :  { %v2535_v38 = vmul.f32 %v3304_v37, %v4172_v54  ;;  %v2587_v57 = vadd.f32 %v2586_v46, %v2585_v34  ;;  %v2592_v36 = vadd.f32 %v2591_v19, %v2590_v42  ;;  %v2681_v0 = vsel %vm735_vm9, %v2580_v7, %v2680_v29  ;;  %p3339_p1 = scmp.lt.s32.totalorder %s2740_s20, %s2740_s20 }
 0x8ee   :  { %v2600_v62 = vrot.slane %v2599_v4, 1  ;;  %v2606_v35 = vadd.f32 %v2605_v20, %v2604_v50  ;;  %v2613_v22 = vadd.f32 %v2612_v48, %v2611_v59  ;;  %v2618_v61 = vadd.f32 %v2617_v52, %v2616_v53 }
 0x8ef   :  { %v3306_v45 = vpop.eup %3305  ;;  %v2593_v30 = vrot.slane %v2592_v36, 1  ;;  %v2682_v14 = vsel %vm737_vm10, %v2587_v57, %v2681_v0  ;;  %v2623_v6 = vsel %vm950_vm11, %v2535_v38, 0.0  ;;  %v2637_v26 = vsel %vm950_vm11, %v2537_v63, 0.0 }
 0x8f0   :  { %v2536_v44 = vmul.f32 %v3306_v45, %v4186_v24  ;;  %v2601_v8 = vadd.f32 %v2600_v62, %v2599_v4  ;;  %v2607_v54 = vrot.slane %v2606_v35, 1  ;;  %v2614_v17 = vrot.slane %v2613_v22, 1 }
 0x8f1   :  { %v2594_v2 = vadd.f32 %v2593_v30, %v2592_v36  ;;  %v2619_v21 = vrot.slane %v2618_v61, 2  ;;  %v2624_v41 = vrot.slane %v2623_v6, 4  ;;  %v2638_v3 = vrot.slane %v2637_v26, 4 }
 0x8f2   :  { %v2608_v16 = vadd.f32 %v2607_v54, %v2606_v35  ;;  %v2615_v11 = vadd.f32 %v2614_v17, %v2613_v22  ;;  %v2630_v60 = vsel %vm950_vm11, %v2536_v44, 0.0  ;;  %v2644_v55 = vsel %vm950_vm11, %v2538_v32, 0.0 }
 0x8f3   :  { %v2683_v56 = vsel %vm739_vm12, %v2594_v2, %v2682_v14  ;;  %v2620_v1 = vadd.f32 %v2619_v21, %v2618_v61  ;;  %v2625_v23 = vadd.f32 %v2624_v41, %v2623_v6  ;;  %v2631_v58 = vrot.slane %v2630_v60, 4 }
 0x8f4   :  { %2691 = vrot.lane.b32.xlu0 %v2683_v56, %s3361_s3  ;;  %v2639_v24 = vadd.f32 %v2638_v3, %v2637_v26  ;;  %v2645_v10 = vrot.slane %v2644_v55, 4  ;;  %v2684_v40 = vsel %vm727_vm5, %v2608_v16, %v2601_v8  ;;  %v2838_v20 = vmul.f32 -1.442695, %v4099_v15 }
 0x8f5   :  { %v2621_v12 = vrot.slane %v2620_v1, 1  ;;  %v2626_v39 = vrot.slane %v2625_v23, 2  ;;  %v2632_v47 = vadd.f32 %v2631_v58, %v2630_v60  ;;  %v2685_v31 = vsel %vm729_vm6, %v2615_v11, %v2684_v40 }
 0x8f6   :  { %v2640_v43 = vrot.slane %v2639_v24, 2  ;;  %v2646_v51 = vadd.f32 %v2645_v10, %v2644_v55  ;;  %3307 = vpow2.f32 %v2838_v20  ;;  %v2839_v52 = vmul.f32 -1.442695, %v4182_v5 }
 0x8f7   :  { %v2622_v25 = vadd.f32 %v2621_v12, %v2620_v1  ;;  %v2627_v49 = vadd.f32 %v2626_v39, %v2625_v23  ;;  %v2633_v28 = vrot.slane %v2632_v47, 2 }
 0x8f8   :  { %v2641_v63 = vadd.f32 %v2640_v43, %v2639_v24  ;;  %v2647_v32 = vrot.slane %v2646_v51, 2  ;;  %3309 = vpow2.f32 %v2839_v52 }
 0x8f9   :  { %v2628_v33 = vrot.slane %v2627_v49, 1  ;;  %v2634_v34 = vadd.f32 %v2633_v28, %v2632_v47  ;;  %v2686_v42 = vsel %vm731_vm7, %v2622_v25, %v2685_v31 }
 0x8fa   :  { %v2642_v9 = vrot.slane %v2641_v63, 1  ;;  %v2648_v29 = vadd.f32 %v2647_v32, %v2646_v51 }
 0x8fb   :  { %v2629_v27 = vadd.f32 %v2628_v33, %v2627_v49  ;;  %v2635_v50 = vrot.slane %v2634_v34, 1 }
 0x8fc   :  { %v2649_v59 = vrot.slane %v2648_v29, 1  ;;  %v2643_v46 = vadd.f32 %v2642_v9, %v2641_v63 }
 0x8fd   :  { %v2636_v18 = vadd.f32 %v2635_v50, %v2634_v34  ;;  %v2687_v7 = vsel %vm733_vm8, %v2629_v27, %v2686_v42 }
 0x8fe   :  { %v2650_v19 = vadd.f32 %v2649_v59, %v2648_v29 }
 0x8ff   :  { %v2688_v53 = vsel %vm735_vm9, %v2636_v18, %v2687_v7 }
 0x900   :  { %v2689_v37 = vsel %vm737_vm10, %v2643_v46, %v2688_v53  ;;  %v3308_v48 = vpop.eup %3307 }
 0x901   :  { %v2690_v4 = vsel %vm739_vm12, %v2650_v19, %v2689_v37  ;;  %v2363_v38 = vadd.f32 1.0, %v3308_v48 }
 0x902   :  { %2693 = vrot.lane.b32.xlu1 %v2690_v4, %s3361_s3  ;;  %v3310_v57 = vpop.eup %3309 }
 0x903   :  { %3311 = vrcp.f32 %v2363_v38  ;;  %v2364_v62 = vadd.f32 1.0, %v3310_v57 }
 0x905   :  { %3313 = vrcp.f32 %v2364_v62 }
 0x90d   :  { %v3312_v0 = vpop.eup %3311 }
 0x90f   :  { %v3314_v30 = vpop.eup %3313 }
 0x93f   :  { %v2654_v36 = vpop.permute.xlu0 %2653 }
 0x940   :  { %v2659_v35 = vmul.f32 %v3312_v0, %v2654_v36 }
 0x95e   :  { %v2656_v45 = vpop.permute.xlu1 %2655 }
 0x95f   :  { %v2660_v15 = vmul.f32 %v3314_v30, %v2656_v45 }
 0x966   :  { %v2692_v22 = vpop.permute.xlu0 %2691 }
 0x967   :  { %v2697_v61 = vadd.f32 %v2692_v22, %v2659_v35 }
 0x969   :  { %3315 = vtanh.f32 %v2697_v61 }
 0x973   :  { %v3316_v14 = vpop.eup %3315 }
 0x974   :  { %v2694_v6 = vpop.permute.xlu1 %2693  ;;  %2703 = vrot.lane.b32.xlu0 %v3316_v14, %s3361_s3 }
 0x975   :  { %v2698_v5 = vadd.f32 %v2694_v6, %v2660_v15 }
 0x977   :  { %3317 = vtanh.f32 %v2698_v5 }
 0x981   :  { %v3318_v26 = vpop.eup %3317 }
 0x982   :  { %2705 = vrot.lane.b32.xlu1 %v3318_v26, %s3361_s3 }
 0x986   :  { %2721 = vrot.lane.b32.xlu1 %v2697_v61, %s3361_s3 }
 0x98a   :  { %2723 = vrot.lane.b32.xlu1 %v2698_v5, %s3361_s3  ;;  %s3334_s3 = scalar_lea.vmem %s2740_s20, 256 }
 0x98b   :  { %p3335_p0 = scmp.ne.s32.totalorder %s2740_s20, %s3334_s3  ;;  %p3340_p2 = scmp.lt.s32.totalorder %s3334_s3, %s3334_s3 }
 0x98d   :  { %p3341_p3 = por %p3340_p2, %p3339_p1 }
 0x98f   :  { %p3342_p4 = pnand %p3341_p3, %p3335_p0 }
 0x9e6   :  { %v2704_v44 = vpop.permute.xlu0 %2703 }
 0x9e7   :  { %v2709_v8 = vmul.f32 %v3312_v0, %v2704_v44 }
 0x9e9   :  { %2713 = vrot.lane.b32.xlu0 %v2709_v8, %s3362_s23 }
 0x9f4   :  { %v2706_v54 = vpop.permute.xlu1 %2705 }
 0x9f5   :  { %v2710_v17 = vmul.f32 %v3314_v30, %v2706_v54 }
 0x9f7   :  { %2715 = vrot.lane.b32.xlu0 %v2710_v17, %s3362_s23 }
 0x9f8   :  { %v2722_v2 = vpop.permute.xlu1 %2721 }
 0x9fc   :  { %v2724_v16 = vpop.permute.xlu1 %2723 }
 0xa5b   :  { %v2714_v21 = vpop.permute.xlu0 %2713 }
 0xa5c   :  { %v2727_v41 = vsel %vm444_vm3, %v2714_v21, %v2722_v2 }
 0xa5d   :  { %v2729_v3 = vmul.f32 %v3435_v13, %v2727_v41 }
 0xa5f   :  { %2732 = vst.msk [vmem:[#allocation2] sm:$0xff] %vm2731_vm13, %v2729_v3 }
 0xa69   :  { %v2716_v11 = vpop.permute.xlu0 %2715 }
 0xa6a   :  { %v2728_v60 = vsel %vm444_vm3, %v2716_v11, %v2724_v16 }
 0xa6b   :  { %2733 = vst.msk [vmem:[#allocation2 + $0x8] sm:$0xff] %vm2731_vm13, %v2728_v60 }
 0xa6c   :  { %3345 = shalt.err (!%p3342_p4)
}
 0xa6d   :  { %s3346_s29 = scalar_lea.hbm %s4250_s5, 256 }
 0xa6e   :  { %p3347_p5 = scmp.ne.s32.totalorder %s4250_s5, %s3346_s29  ;;  %p3350_p6 = scmp.lt.u32.totalorder %s3346_s29, %s4250_s5 }
 0xa70   :  { %p3352_p7 = pnand %p3350_p6, %p3347_p5 }
 0xa72   :  { %3355 = shalt.err (!%p3352_p7)
}
 0xa73   :  { %s3364_s9 = smov 128   ;;  %s3365_s10 = smov 8  }
 0xa74   :  { %2745 = dma.vmem_to_hbm [thread:$0]  %s2740_s20, 256, %s4250_s5, [#allocation3], %s3364_s9, %s3364_s9, %s3365_s10  }
 0xa75   :  { %3356 = dma.done.wait [#allocation3], 256  }
 0xa76   :  { %3357 = vsyncadd [#allocation3], 4294967040 }
 0xa77   :  { %2749 = vsyncpa [#allocation3], 1 }

</bundles_post_ra>
